<compile_context>
chip_gen: v7x
topology: tpu7x:2x2x1
jax: 0.10.0
libtpu: 0.0.40
codegen_flags: <defaults>
</compile_context>

<pallas_src>
import math
import functools

import jax
import jax.numpy as jnp
from jax.experimental import pallas as pl
from jax.experimental.pallas import tpu as pltpu


# ----------------------------------------------------------------------------
# Fused MHA kernel: per (batch, q-tile) block, all heads + fc_out epilogue.
# ----------------------------------------------------------------------------
def _mha_kernel(q_ref, k_ref, v_ref, mq_ref, mk_ref, mv_ref, wo_ref, bo_ref,
                o_ref, kp_ref, vp_ref, cat_ref, *, heads, head_dim):
    # q_ref: [1, tq, D] bf16     k_ref / v_ref: [1, Sk, D] bf16
    # mq/mk/mv: [D, D] bf16 block-diag per-head projections (scale folded in mq)
    # wo: [D, D] bf16 = fc_out.weight.T     bo: [1, D] f32
    # kp/vp: [Sk, D] bf16 scratch (projected K/V, reused across q-tiles)
    # cat:   [tq, D] bf16 scratch (concat-heads buffer for the fc_out epilogue)

    # Project K/V once per batch (first q-tile of the batch) into VMEM scratch.
    @pl.when(pl.program_id(1) == 0)
    def _():
        kp_ref[...] = jnp.dot(k_ref[0], mk_ref[...],
                              preferred_element_type=jnp.float32
                              ).astype(jnp.bfloat16)
        vp_ref[...] = jnp.dot(v_ref[0], mv_ref[...],
                              preferred_element_type=jnp.float32
                              ).astype(jnp.bfloat16)

    # Q projection per q-tile; 1/sqrt(embed_size) already folded into mq.
    qp = jnp.dot(q_ref[0], mq_ref[...],
                 preferred_element_type=jnp.float32).astype(jnp.bfloat16)
    kp = kp_ref[...]
    vp = vp_ref[...]

    # TODO(synk): for large head counts (>= ~8) switch to lax.fori_loop with
    #             pl.ds slices to bound live ranges; full unroll is fine here.
    for h in range(heads):
        lo = h * head_dim
        hi = lo + head_dim
        qh = qp[:, lo:hi]
        kh = kp[:, lo:hi]
        vh = vp[:, lo:hi]

        # scores: contract head_dim of q and k directly (no k.T relayout)
        s = jax.lax.dot_general(qh, kh, (((1,), (1,)), ((), ())),
                                preferred_element_type=jnp.float32)

        # TODO(synk): additive mask (masked_fill(mask == 0, -1e20)) would go here.

        # softmax stats in fp32; normalization deferred to the head output
        m = jnp.max(s, axis=-1, keepdims=True)
        p = jnp.exp(s - m)
        l = jnp.sum(p, axis=-1, keepdims=True)

        oh = jnp.dot(p.astype(jnp.bfloat16), vh,
                     preferred_element_type=jnp.float32)
        oh = oh * pl.reciprocal(l, approx=True)          # EUP slot, ~free
        cat_ref[:, lo:hi] = oh.astype(jnp.bfloat16)

    # fc_out fused as ONE D-deep concat-heads matmul.
    out = jnp.dot(cat_ref[...], wo_ref[...], preferred_element_type=jnp.float32)
    o_ref[0] = (out + bo_ref[...]).astype(o_ref.dtype)


# ----------------------------------------------------------------------------
# VMEM-aware tiling helpers
# ----------------------------------------------------------------------------
def _vmem_budget_bytes():
    try:
        cap = pltpu.get_tpu_info().vmem_capacity_bytes
    except Exception:
        cap = 64 * 1024 * 1024          # conservative (v7x-sized) default
    # Leave headroom for Mosaic internals; never request more than 96 MiB.
    return int(min((cap * 3) // 4, 96 * 1024 * 1024))


def _block_vmem_bytes(tq, sk, d):
    q_blk = 2 * tq * d * 2              # bf16 query tile, double-buffered
    kv_blk = 2 * 2 * sk * d * 2         # bf16 K and V blocks, double-buffered
    kv_scr = 2 * sk * d * 2             # projected K/V bf16 scratch
    w_blk = 4 * d * d * 2 + d * 4       # mq/mk/mv/wo (+ bias), single-buffered
    o_blk = 2 * tq * d * 4              # fp32 output tile, double-buffered
    interm = tq * sk * 4 + 3 * tq * d * 4   # fp32 scores + misc intermediates
    return q_blk + kv_blk + kv_scr + w_blk + o_blk + interm


def _pick_q_tile(sq, sk, d, budget):
    for t in (1024, 512, 256, 128, 64, 32, 16, 8):
        if sq % t == 0 and _block_vmem_bytes(t, sk, d) <= budget:
            return t
    # Small / ragged sequences: one block over the whole query length.
    return sq


# ----------------------------------------------------------------------------
# pallas_call builder (with fallback for jax versions lacking pipeline_mode)
# ----------------------------------------------------------------------------
def _mha_pallas_call(q, k, v, mq, mk, mv, wo, bo, *, heads, head_dim, tq,
                     vmem_limit, single_buffer_weights):
    N, Sq, D = q.shape
    Sk = k.shape[1]

    w_kwargs = {}
    if single_buffer_weights:
        # Grid-invariant blocks: double buffering buys nothing, free the VMEM.
        w_kwargs = dict(pipeline_mode=pl.Buffered(1))
    dd_spec = pl.BlockSpec((D, D), lambda b, qi: (0, 0), **w_kwargs)
    bias_spec = pl.BlockSpec((1, D), lambda b, qi: (0, 0), **w_kwargs)

    kern = functools.partial(_mha_kernel, heads=heads, head_dim=head_dim)
    return pl.pallas_call(
        kern,
        out_shape=jax.ShapeDtypeStruct((N, Sq, D), jnp.float32),
        grid=(N, Sq // tq),
        in_specs=[
            pl.BlockSpec((1, tq, D), lambda b, qi: (b, qi, 0)),   # query tile
            pl.BlockSpec((1, Sk, D), lambda b, qi: (b, 0, 0)),    # keys (per batch)
            pl.BlockSpec((1, Sk, D), lambda b, qi: (b, 0, 0)),    # values (per batch)
            dd_spec, dd_spec, dd_spec, dd_spec,                   # mq, mk, mv, wo
            bias_spec,                                            # fc_out bias
        ],
        out_specs=pl.BlockSpec((1, tq, D), lambda b, qi: (b, qi, 0)),
        scratch_shapes=[
            pltpu.VMEM((Sk, D), jnp.bfloat16),   # projected K (per batch)
            pltpu.VMEM((Sk, D), jnp.bfloat16),   # projected V (per batch)
            pltpu.VMEM((tq, D), jnp.bfloat16),   # concat-heads buffer
        ],
        compiler_params=pltpu.CompilerParams(
            # Only the batch axis is megacore-split; the q-tile axis carries the
            # once-per-batch K/V projection through scratch, so it is sequential.
            dimension_semantics=("parallel", "arbitrary"),
            vmem_limit_bytes=int(vmem_limit),
        ),
    )(q, k, v, mq, mk, mv, wo, bo)


# ----------------------------------------------------------------------------
# Wrapper
# ----------------------------------------------------------------------------
def multi_head_attention(values, keys, query, params, heads, mask=None):
    # values/keys/query: [N, len, embed_size] float32 (batch-first), as in PyTorch.
    if mask is not None:
        # TODO(synk): masked_fill(mask == 0, -1e20) path not wired.
        raise NotImplementedError("mask is not supported by this kernel")

    N, Sq, D = query.shape
    Sk = keys.shape[1]
    assert keys.shape[1] == values.shape[1], "key_len must equal value_len"
    head_dim = D // heads
    assert head_dim * heads == D, "embed_size must be divisible by heads"
    scale = 1.0 / math.sqrt(D)           # reference scales by sqrt(embed_size)

    # Fold the shared per-head Linear(head_dim, head_dim) into block-diagonal
    # [D, D] matrices (kron(I_H, W.T)); fold the softmax scale into mq.
    eye_h = jnp.eye(heads, dtype=jnp.float32)
    mq = (jnp.kron(eye_h, params["w_q"].T) * scale).astype(jnp.bfloat16)
    mk = jnp.kron(eye_h, params["w_k"].T).astype(jnp.bfloat16)
    mv = jnp.kron(eye_h, params["w_v"].T).astype(jnp.bfloat16)
    wo = params["w_fc"].T.astype(jnp.bfloat16)           # [D_in, D_out]
    bo = params["b_fc"].reshape(1, D).astype(jnp.float32)

    # bf16 activations for the MXU / DMA; fp32 softmax stats & accumulation.
    q_bf = query.astype(jnp.bfloat16)
    k_bf = keys.astype(jnp.bfloat16)
    v_bf = values.astype(jnp.bfloat16)

    vmem_limit = _vmem_budget_bytes()
    tq = _pick_q_tile(Sq, Sk, D, vmem_limit)

    call = functools.partial(
        _mha_pallas_call, q_bf, k_bf, v_bf, mq, mk, mv, wo, bo,
        heads=heads, head_dim=head_dim, tq=tq, vmem_limit=vmem_limit)
    try:
        return call(single_buffer_weights=True)
    except Exception:
        # Fallback if this jax build rejects BlockSpec(pipeline_mode=Buffered(1)).
        return call(single_buffer_weights=False)


# ----------------------------------------------------------------------------
# Parameter init (mirrors the PyTorch module's parameter shapes)
# ----------------------------------------------------------------------------
def init_params(key, embed_size, heads):
    hd = embed_size // heads
    ks = jax.random.split(key, 5)
    sw = 1.0 / math.sqrt(hd)
    so = 1.0 / math.sqrt(embed_size)
    return {
        # shared-across-heads per-head projections, PyTorch layout [out, in]
        "w_v": jax.random.normal(ks[0], (hd, hd), jnp.float32) * sw,
        "w_k": jax.random.normal(ks[1], (hd, hd), jnp.float32) * sw,
        "w_q": jax.random.normal(ks[2], (hd, hd), jnp.float32) * sw,
        # fc_out: Linear(embed_size, embed_size), PyTorch layout [out, in]
        "w_fc": jax.random.normal(ks[3], (embed_size, embed_size), jnp.float32) * so,
        "b_fc": jax.random.normal(ks[4], (embed_size,), jnp.float32) * so,
    }


# Pure-JAX fp32 reference mirroring the PyTorch forward (for validation).
def _reference(values, keys, query, params, heads):
    N, Sq, D = query.shape
    hd = D // heads
    v = values.reshape(N, -1, heads, hd) @ params["w_v"].T
    k = keys.reshape(N, -1, heads, hd) @ params["w_k"].T
    q = query.reshape(N, Sq, heads, hd) @ params["w_q"].T
    energy = jnp.einsum("nqhd,nkhd->nhqk", q, k)
    attn = jax.nn.softmax(energy / math.sqrt(D), axis=3)
    out = jnp.einsum("nhql,nlhd->nqhd", attn, v).reshape(N, Sq, D)
    return out @ params["w_fc"].T + params["b_fc"]


if __name__ == "__main__":
    N, S, D, HEADS = 2, 8, 32, 4

    key = jax.random.PRNGKey(0)
    kv_, kk_, kq_, kp_ = jax.random.split(key, 4)
    values = jax.random.normal(kv_, (N, S, D), jnp.float32)
    keys = jax.random.normal(kk_, (N, S, D), jnp.float32)
    query = jax.random.normal(kq_, (N, S, D), jnp.float32)
    params = init_params(kp_, D, HEADS)

    out = multi_head_attention(values, keys, query, params, HEADS, mask=None)
    out = jax.block_until_ready(out)

    ref = _reference(values, keys, query, params, HEADS)
    assert out.shape == (N, S, D)
    assert bool(jnp.all(jnp.isfinite(out)))
    # bf16 MXU operands + approx reciprocal vs fp32 reference -> loose tolerance
    assert bool(jnp.allclose(out, ref, atol=5e-2, rtol=5e-2)), (
        "max abs err = %f" % float(jnp.max(jnp.abs(out - ref))))
    print("KERNEL_OK")
</pallas_src>

<mosaic_0001>
module attributes {stable_mosaic.version = 11 : i64} {
  func.func @_mha_kernel(%arg0: i32, %arg1: i32, %arg2: memref<1x8x32xbf16, #tpu.memory_space<vmem>>, %arg3: memref<1x8x32xbf16, #tpu.memory_space<vmem>>, %arg4: memref<1x8x32xbf16, #tpu.memory_space<vmem>>, %arg5: memref<32x32xbf16, #tpu.memory_space<vmem>>, %arg6: memref<32x32xbf16, #tpu.memory_space<vmem>>, %arg7: memref<32x32xbf16, #tpu.memory_space<vmem>>, %arg8: memref<32x32xbf16, #tpu.memory_space<vmem>>, %arg9: memref<1x32xf32, #tpu.memory_space<vmem>>, %arg10: memref<1x8x32xf32, #tpu.memory_space<vmem>>, %arg11: memref<8x32xbf16, #tpu.memory_space<vmem>>, %arg12: memref<8x32xbf16, #tpu.memory_space<vmem>>, %arg13: memref<8x32xbf16, #tpu.memory_space<vmem>>) attributes {dimension_semantics = [#tpu.dimension_semantics<parallel>, #tpu.dimension_semantics<arbitrary>], iteration_bounds = array<i64: 2, 1>, scalar_prefetch = 0 : i64, scratch_operands = 3 : i64, tpu.core_type = #tpu.core_type<tc>, window_params = [{transform_indices = @transform_0, window_bounds = array<i64: 1, 8, 32>}, {transform_indices = @transform_1, window_bounds = array<i64: 1, 8, 32>}, {transform_indices = @transform_2, window_bounds = array<i64: 1, 8, 32>}, {pipeline_mode = #tpu.pipeline_mode<synchronous>, transform_indices = @transform_3, window_bounds = array<i64: 32, 32>}, {pipeline_mode = #tpu.pipeline_mode<synchronous>, transform_indices = @transform_4, window_bounds = array<i64: 32, 32>}, {pipeline_mode = #tpu.pipeline_mode<synchronous>, transform_indices = @transform_5, window_bounds = array<i64: 32, 32>}, {pipeline_mode = #tpu.pipeline_mode<synchronous>, transform_indices = @transform_6, window_bounds = array<i64: 32, 32>}, {pipeline_mode = #tpu.pipeline_mode<synchronous>, transform_indices = @transform_7, window_bounds = array<i64: 1, 32>}, {transform_indices = @transform_8, window_bounds = array<i64: 1, 8, 32>}]} {
    %c0_i32 = arith.constant 0 : i32
    %0 = arith.cmpi eq, %arg1, %c0_i32 : i32
    %1 = arith.extui %0 : i1 to i32
    %c0_i32_0 = arith.constant 0 : i32
    %2 = arith.cmpi ne, %1, %c0_i32_0 : i32
    scf.if %2 {
      %c0_40 = arith.constant 0 : index
      %c0_41 = arith.constant 0 : index
      %c0_42 = arith.constant 0 : index
      %91 = vector.load %arg3[%c0_40, %c0_41, %c0_42] : memref<1x8x32xbf16, #tpu.memory_space<vmem>>, vector<1x8x32xbf16>
      %92 = vector.shape_cast %91 : vector<1x8x32xbf16> to vector<8x32xbf16>
      %c0_43 = arith.constant 0 : index
      %c0_44 = arith.constant 0 : index
      %93 = vector.load %arg6[%c0_43, %c0_44] : memref<32x32xbf16, #tpu.memory_space<vmem>>, vector<32x32xbf16>
      %cst_45 = arith.constant dense<0.000000e+00> : vector<8x32xf32>
      %94 = tpu.matmul %92, %93, %cst_45 {dimension_numbers = #tpu.dot_dimension_numbers<[1], [0], [0], [1], [0, 0, 1, 1], [], []>} : vector<8x32xbf16>, vector<32x32xbf16>, vector<8x32xf32> -> vector<8x32xf32>
      %95 = arith.truncf %94 : vector<8x32xf32> to vector<8x32xbf16>
      %c0_46 = arith.constant 0 : index
      %c0_47 = arith.constant 0 : index
      %96 = vector.load %arg11[%c0_46, %c0_47] : memref<8x32xbf16, #tpu.memory_space<vmem>>, vector<8x32xbf16>
      tpu.vector_store %arg11[%c0_46, %c0_47], %95 {strides = array<i32>} : memref<8x32xbf16, #tpu.memory_space<vmem>>, vector<8x32xbf16>,
      %c0_48 = arith.constant 0 : index
      %c0_49 = arith.constant 0 : index
      %c0_50 = arith.constant 0 : index
      %97 = vector.load %arg4[%c0_48, %c0_49, %c0_50] : memref<1x8x32xbf16, #tpu.memory_space<vmem>>, vector<1x8x32xbf16>
      %98 = vector.shape_cast %97 : vector<1x8x32xbf16> to vector<8x32xbf16>
      %c0_51 = arith.constant 0 : index
      %c0_52 = arith.constant 0 : index
      %99 = vector.load %arg7[%c0_51, %c0_52] : memref<32x32xbf16, #tpu.memory_space<vmem>>, vector<32x32xbf16>
      %cst_53 = arith.constant dense<0.000000e+00> : vector<8x32xf32>
      %100 = tpu.matmul %98, %99, %cst_53 {dimension_numbers = #tpu.dot_dimension_numbers<[1], [0], [0], [1], [0, 0, 1, 1], [], []>} : vector<8x32xbf16>, vector<32x32xbf16>, vector<8x32xf32> -> vector<8x32xf32>
      %101 = arith.truncf %100 : vector<8x32xf32> to vector<8x32xbf16>
      %c0_54 = arith.constant 0 : index
      %c0_55 = arith.constant 0 : index
      %102 = vector.load %arg12[%c0_54, %c0_55] : memref<8x32xbf16, #tpu.memory_space<vmem>>, vector<8x32xbf16>
      tpu.vector_store %arg12[%c0_54, %c0_55], %101 {strides = array<i32>} : memref<8x32xbf16, #tpu.memory_space<vmem>>, vector<8x32xbf16>,
    } else {
    }
    %c0 = arith.constant 0 : index
    %c0_1 = arith.constant 0 : index
    %c0_2 = arith.constant 0 : index
    %3 = vector.load %arg2[%c0, %c0_1, %c0_2] : memref<1x8x32xbf16, #tpu.memory_space<vmem>>, vector<1x8x32xbf16>
    %4 = vector.shape_cast %3 : vector<1x8x32xbf16> to vector<8x32xbf16>
    %c0_3 = arith.constant 0 : index
    %c0_4 = arith.constant 0 : index
    %5 = vector.load %arg5[%c0_3, %c0_4] : memref<32x32xbf16, #tpu.memory_space<vmem>>, vector<32x32xbf16>
    %cst = arith.constant dense<0.000000e+00> : vector<8x32xf32>
    %6 = tpu.matmul %4, %5, %cst {dimension_numbers = #tpu.dot_dimension_numbers<[1], [0], [0], [1], [0, 0, 1, 1], [], []>} : vector<8x32xbf16>, vector<32x32xbf16>, vector<8x32xf32> -> vector<8x32xf32>
    %7 = arith.truncf %6 : vector<8x32xf32> to vector<8x32xbf16>
    %c0_5 = arith.constant 0 : index
    %c0_6 = arith.constant 0 : index
    %8 = vector.load %arg11[%c0_5, %c0_6] : memref<8x32xbf16, #tpu.memory_space<vmem>>, vector<8x32xbf16>
    %c0_7 = arith.constant 0 : index
    %c0_8 = arith.constant 0 : index
    %9 = vector.load %arg12[%c0_7, %c0_8] : memref<8x32xbf16, #tpu.memory_space<vmem>>, vector<8x32xbf16>
    %10 = vector.extract_strided_slice %7 {offsets = [0, 0], sizes = [8, 8], strides = [1, 1]} : vector<8x32xbf16> to vector<8x8xbf16>
    %11 = vector.extract_strided_slice %8 {offsets = [0, 0], sizes = [8, 8], strides = [1, 1]} : vector<8x32xbf16> to vector<8x8xbf16>
    %12 = vector.extract_strided_slice %9 {offsets = [0, 0], sizes = [8, 8], strides = [1, 1]} : vector<8x32xbf16> to vector<8x8xbf16>
    %cst_9 = arith.constant dense<0.000000e+00> : vector<8x8xf32>
    %13 = tpu.matmul %10, %11, %cst_9 {dimension_numbers = #tpu.dot_dimension_numbers<[1], [1], [0], [0], [0, 0, 1, 0], [], []>} : vector<8x8xbf16>, vector<8x8xbf16>, vector<8x8xf32> -> vector<8x8xf32>
    %cst_10 = arith.constant dense<0xFF800000> : vector<8xf32>
    %14 = vector.multi_reduction <maximumf>, %13, %cst_10 [1] : vector<8x8xf32> to vector<8xf32>
    %15 = vector.shape_cast %14 : vector<8xf32> to vector<8x1xf32>
    %16 = vector.broadcast %15 : vector<8x1xf32> to vector<8x8xf32>
    %17 = arith.subf %13, %16 : vector<8x8xf32>
    %18 = math.exp %17 : vector<8x8xf32>
    %cst_11 = arith.constant dense<0.000000e+00> : vector<8xf32>
    %19 = vector.multi_reduction <add>, %18, %cst_11 [1] : vector<8x8xf32> to vector<8xf32>
    %20 = vector.shape_cast %19 : vector<8xf32> to vector<8x1xf32>
    %21 = arith.truncf %18 : vector<8x8xf32> to vector<8x8xbf16>
    %cst_12 = arith.constant dense<0.000000e+00> : vector<8x8xf32>
    %22 = tpu.matmul %21, %12, %cst_12 {dimension_numbers = #tpu.dot_dimension_numbers<[1], [0], [0], [1], [0, 0, 1, 1], [], []>} : vector<8x8xbf16>, vector<8x8xbf16>, vector<8x8xf32> -> vector<8x8xf32>
    %23 = tpu.reciprocal %20 {approx = true} : vector<8x1xf32> -> vector<8x1xf32>
    %24 = vector.broadcast %23 : vector<8x1xf32> to vector<8x8xf32>
    %25 = arith.mulf %22, %24 : vector<8x8xf32>
    %26 = arith.truncf %25 : vector<8x8xf32> to vector<8x8xbf16>
    %c0_13 = arith.constant 0 : index
    %c0_14 = arith.constant 0 : index
    %27 = vector.load %arg13[%c0_13, %c0_14] : memref<8x32xbf16, #tpu.memory_space<vmem>>, vector<8x8xbf16>
    tpu.vector_store %arg13[%c0_13, %c0_14], %26 {strides = array<i32>} : memref<8x32xbf16, #tpu.memory_space<vmem>>, vector<8x8xbf16>,
    %28 = vector.extract_strided_slice %7 {offsets = [0, 8], sizes = [8, 8], strides = [1, 1]} : vector<8x32xbf16> to vector<8x8xbf16>
    %29 = vector.extract_strided_slice %8 {offsets = [0, 8], sizes = [8, 8], strides = [1, 1]} : vector<8x32xbf16> to vector<8x8xbf16>
    %30 = vector.extract_strided_slice %9 {offsets = [0, 8], sizes = [8, 8], strides = [1, 1]} : vector<8x32xbf16> to vector<8x8xbf16>
    %cst_15 = arith.constant dense<0.000000e+00> : vector<8x8xf32>
    %31 = tpu.matmul %28, %29, %cst_15 {dimension_numbers = #tpu.dot_dimension_numbers<[1], [1], [0], [0], [0, 0, 1, 0], [], []>} : vector<8x8xbf16>, vector<8x8xbf16>, vector<8x8xf32> -> vector<8x8xf32>
    %cst_16 = arith.constant dense<0xFF800000> : vector<8xf32>
    %32 = vector.multi_reduction <maximumf>, %31, %cst_16 [1] : vector<8x8xf32> to vector<8xf32>
    %33 = vector.shape_cast %32 : vector<8xf32> to vector<8x1xf32>
    %34 = vector.broadcast %33 : vector<8x1xf32> to vector<8x8xf32>
    %35 = arith.subf %31, %34 : vector<8x8xf32>
    %36 = math.exp %35 : vector<8x8xf32>
    %cst_17 = arith.constant dense<0.000000e+00> : vector<8xf32>
    %37 = vector.multi_reduction <add>, %36, %cst_17 [1] : vector<8x8xf32> to vector<8xf32>
    %38 = vector.shape_cast %37 : vector<8xf32> to vector<8x1xf32>
    %39 = arith.truncf %36 : vector<8x8xf32> to vector<8x8xbf16>
    %cst_18 = arith.constant dense<0.000000e+00> : vector<8x8xf32>
    %40 = tpu.matmul %39, %30, %cst_18 {dimension_numbers = #tpu.dot_dimension_numbers<[1], [0], [0], [1], [0, 0, 1, 1], [], []>} : vector<8x8xbf16>, vector<8x8xbf16>, vector<8x8xf32> -> vector<8x8xf32>
    %41 = tpu.reciprocal %38 {approx = true} : vector<8x1xf32> -> vector<8x1xf32>
    %42 = vector.broadcast %41 : vector<8x1xf32> to vector<8x8xf32>
    %43 = arith.mulf %40, %42 : vector<8x8xf32>
    %44 = arith.truncf %43 : vector<8x8xf32> to vector<8x8xbf16>
    %c0_19 = arith.constant 0 : index
    %c8 = arith.constant 8 : index
    %45 = vector.load %arg13[%c0_19, %c8] : memref<8x32xbf16, #tpu.memory_space<vmem>>, vector<8x8xbf16>
    tpu.vector_store %arg13[%c0_19, %c8], %44 {strides = array<i32>} : memref<8x32xbf16, #tpu.memory_space<vmem>>, vector<8x8xbf16>,
    %46 = vector.extract_strided_slice %7 {offsets = [0, 16], sizes = [8, 8], strides = [1, 1]} : vector<8x32xbf16> to vector<8x8xbf16>
    %47 = vector.extract_strided_slice %8 {offsets = [0, 16], sizes = [8, 8], strides = [1, 1]} : vector<8x32xbf16> to vector<8x8xbf16>
    %48 = vector.extract_strided_slice %9 {offsets = [0, 16], sizes = [8, 8], strides = [1, 1]} : vector<8x32xbf16> to vector<8x8xbf16>
    %cst_20 = arith.constant dense<0.000000e+00> : vector<8x8xf32>
    %49 = tpu.matmul %46, %47, %cst_20 {dimension_numbers = #tpu.dot_dimension_numbers<[1], [1], [0], [0], [0, 0, 1, 0], [], []>} : vector<8x8xbf16>, vector<8x8xbf16>, vector<8x8xf32> -> vector<8x8xf32>
    %cst_21 = arith.constant dense<0xFF800000> : vector<8xf32>
    %50 = vector.multi_reduction <maximumf>, %49, %cst_21 [1] : vector<8x8xf32> to vector<8xf32>
    %51 = vector.shape_cast %50 : vector<8xf32> to vector<8x1xf32>
    %52 = vector.broadcast %51 : vector<8x1xf32> to vector<8x8xf32>
    %53 = arith.subf %49, %52 : vector<8x8xf32>
    %54 = math.exp %53 : vector<8x8xf32>
    %cst_22 = arith.constant dense<0.000000e+00> : vector<8xf32>
    %55 = vector.multi_reduction <add>, %54, %cst_22 [1] : vector<8x8xf32> to vector<8xf32>
    %56 = vector.shape_cast %55 : vector<8xf32> to vector<8x1xf32>
    %57 = arith.truncf %54 : vector<8x8xf32> to vector<8x8xbf16>
    %cst_23 = arith.constant dense<0.000000e+00> : vector<8x8xf32>
    %58 = tpu.matmul %57, %48, %cst_23 {dimension_numbers = #tpu.dot_dimension_numbers<[1], [0], [0], [1], [0, 0, 1, 1], [], []>} : vector<8x8xbf16>, vector<8x8xbf16>, vector<8x8xf32> -> vector<8x8xf32>
    %59 = tpu.reciprocal %56 {approx = true} : vector<8x1xf32> -> vector<8x1xf32>
    %60 = vector.broadcast %59 : vector<8x1xf32> to vector<8x8xf32>
    %61 = arith.mulf %58, %60 : vector<8x8xf32>
    %62 = arith.truncf %61 : vector<8x8xf32> to vector<8x8xbf16>
    %c0_24 = arith.constant 0 : index
    %c16 = arith.constant 16 : index
    %63 = vector.load %arg13[%c0_24, %c16] : memref<8x32xbf16, #tpu.memory_space<vmem>>, vector<8x8xbf16>
    tpu.vector_store %arg13[%c0_24, %c16], %62 {strides = array<i32>} : memref<8x32xbf16, #tpu.memory_space<vmem>>, vector<8x8xbf16>,
    %64 = vector.extract_strided_slice %7 {offsets = [0, 24], sizes = [8, 8], strides = [1, 1]} : vector<8x32xbf16> to vector<8x8xbf16>
    %65 = vector.extract_strided_slice %8 {offsets = [0, 24], sizes = [8, 8], strides = [1, 1]} : vector<8x32xbf16> to vector<8x8xbf16>
    %66 = vector.extract_strided_slice %9 {offsets = [0, 24], sizes = [8, 8], strides = [1, 1]} : vector<8x32xbf16> to vector<8x8xbf16>
    %cst_25 = arith.constant dense<0.000000e+00> : vector<8x8xf32>
    %67 = tpu.matmul %64, %65, %cst_25 {dimension_numbers = #tpu.dot_dimension_numbers<[1], [1], [0], [0], [0, 0, 1, 0], [], []>} : vector<8x8xbf16>, vector<8x8xbf16>, vector<8x8xf32> -> vector<8x8xf32>
    %cst_26 = arith.constant dense<0xFF800000> : vector<8xf32>
    %68 = vector.multi_reduction <maximumf>, %67, %cst_26 [1] : vector<8x8xf32> to vector<8xf32>
    %69 = vector.shape_cast %68 : vector<8xf32> to vector<8x1xf32>
    %70 = vector.broadcast %69 : vector<8x1xf32> to vector<8x8xf32>
    %71 = arith.subf %67, %70 : vector<8x8xf32>
    %72 = math.exp %71 : vector<8x8xf32>
    %cst_27 = arith.constant dense<0.000000e+00> : vector<8xf32>
    %73 = vector.multi_reduction <add>, %72, %cst_27 [1] : vector<8x8xf32> to vector<8xf32>
    %74 = vector.shape_cast %73 : vector<8xf32> to vector<8x1xf32>
    %75 = arith.truncf %72 : vector<8x8xf32> to vector<8x8xbf16>
    %cst_28 = arith.constant dense<0.000000e+00> : vector<8x8xf32>
    %76 = tpu.matmul %75, %66, %cst_28 {dimension_numbers = #tpu.dot_dimension_numbers<[1], [0], [0], [1], [0, 0, 1, 1], [], []>} : vector<8x8xbf16>, vector<8x8xbf16>, vector<8x8xf32> -> vector<8x8xf32>
    %77 = tpu.reciprocal %74 {approx = true} : vector<8x1xf32> -> vector<8x1xf32>
    %78 = vector.broadcast %77 : vector<8x1xf32> to vector<8x8xf32>
    %79 = arith.mulf %76, %78 : vector<8x8xf32>
    %80 = arith.truncf %79 : vector<8x8xf32> to vector<8x8xbf16>
    %c0_29 = arith.constant 0 : index
    %c24 = arith.constant 24 : index
    %81 = vector.load %arg13[%c0_29, %c24] : memref<8x32xbf16, #tpu.memory_space<vmem>>, vector<8x8xbf16>
    tpu.vector_store %arg13[%c0_29, %c24], %80 {strides = array<i32>} : memref<8x32xbf16, #tpu.memory_space<vmem>>, vector<8x8xbf16>,
    %c0_30 = arith.constant 0 : index
    %c0_31 = arith.constant 0 : index
    %82 = vector.load %arg13[%c0_30, %c0_31] : memref<8x32xbf16, #tpu.memory_space<vmem>>, vector<8x32xbf16>
    %c0_32 = arith.constant 0 : index
    %c0_33 = arith.constant 0 : index
    %83 = vector.load %arg8[%c0_32, %c0_33] : memref<32x32xbf16, #tpu.memory_space<vmem>>, vector<32x32xbf16>
    %cst_34 = arith.constant dense<0.000000e+00> : vector<8x32xf32>
    %84 = tpu.matmul %82, %83, %cst_34 {dimension_numbers = #tpu.dot_dimension_numbers<[1], [0], [0], [1], [0, 0, 1, 1], [], []>} : vector<8x32xbf16>, vector<32x32xbf16>, vector<8x32xf32> -> vector<8x32xf32>
    %c0_35 = arith.constant 0 : index
    %c0_36 = arith.constant 0 : index
    %85 = vector.load %arg9[%c0_35, %c0_36] : memref<1x32xf32, #tpu.memory_space<vmem>>, vector<1x32xf32>
    %86 = vector.broadcast %85 : vector<1x32xf32> to vector<8x32xf32>
    %87 = arith.addf %84, %86 : vector<8x32xf32>
    %c0_37 = arith.constant 0 : index
    %c0_38 = arith.constant 0 : index
    %c0_39 = arith.constant 0 : index
    %88 = vector.load %arg10[%c0_37, %c0_38, %c0_39] : memref<1x8x32xf32, #tpu.memory_space<vmem>>, vector<1x8x32xf32>
    %89 = vector.shape_cast %88 : vector<1x8x32xf32> to vector<8x32xf32>
    %90 = vector.shape_cast %87 : vector<8x32xf32> to vector<1x8x32xf32>
    tpu.vector_store %arg10[%c0_37, %c0_38, %c0_39], %90 {strides = array<i32>} : memref<1x8x32xf32, #tpu.memory_space<vmem>>, vector<1x8x32xf32>,
    return
  }
  func.func @transform_0(%arg0: i32, %arg1: i32) -> (i32, i32, i32) {
    %c0_i32 = arith.constant 0 : i32
    %c0_i32_0 = arith.constant 0 : i32
    return %arg0, %arg1, %c0_i32 : i32, i32, i32
  }
  func.func @transform_1(%arg0: i32, %arg1: i32) -> (i32, i32, i32) {
    %c0_i32 = arith.constant 0 : i32
    %c0_i32_0 = arith.constant 0 : i32
    %c0_i32_1 = arith.constant 0 : i32
    return %arg0, %c0_i32, %c0_i32_0 : i32, i32, i32
  }
  func.func @transform_2(%arg0: i32, %arg1: i32) -> (i32, i32, i32) {
    %c0_i32 = arith.constant 0 : i32
    %c0_i32_0 = arith.constant 0 : i32
    %c0_i32_1 = arith.constant 0 : i32
    return %arg0, %c0_i32, %c0_i32_0 : i32, i32, i32
  }
  func.func @transform_3(%arg0: i32, %arg1: i32) -> (i32, i32) {
    %c0_i32 = arith.constant 0 : i32
    %c0_i32_0 = arith.constant 0 : i32
    %c0_i32_1 = arith.constant 0 : i32
    return %c0_i32, %c0_i32_0 : i32, i32
  }
  func.func @transform_4(%arg0: i32, %arg1: i32) -> (i32, i32) {
    %c0_i32 = arith.constant 0 : i32
    %c0_i32_0 = arith.constant 0 : i32
    %c0_i32_1 = arith.constant 0 : i32
    return %c0_i32, %c0_i32_0 : i32, i32
  }
  func.func @transform_5(%arg0: i32, %arg1: i32) -> (i32, i32) {
    %c0_i32 = arith.constant 0 : i32
    %c0_i32_0 = arith.constant 0 : i32
    %c0_i32_1 = arith.constant 0 : i32
    return %c0_i32, %c0_i32_0 : i32, i32
  }
  func.func @transform_6(%arg0: i32, %arg1: i32) -> (i32, i32) {
    %c0_i32 = arith.constant 0 : i32
    %c0_i32_0 = arith.constant 0 : i32
    %c0_i32_1 = arith.constant 0 : i32
    return %c0_i32, %c0_i32_0 : i32, i32
  }
  func.func @transform_7(%arg0: i32, %arg1: i32) -> (i32, i32) {
    %c0_i32 = arith.constant 0 : i32
    %c0_i32_0 = arith.constant 0 : i32
    %c0_i32_1 = arith.constant 0 : i32
    return %c0_i32, %c0_i32_0 : i32, i32
  }
  func.func @transform_8(%arg0: i32, %arg1: i32) -> (i32, i32, i32) {
    %c0_i32 = arith.constant 0 : i32
    %c0_i32_0 = arith.constant 0 : i32
    return %arg0, %arg1, %c0_i32 : i32, i32, i32
  }
}

module attributes {stable_mosaic.version = 11 : i64} {
  func.func @_mha_kernel(%arg0: i32, %arg1: i32, %arg2: memref<1x8x32xbf16, #tpu.memory_space<vmem>>, %arg3: memref<1x8x32xbf16, #tpu.memory_space<vmem>>, %arg4: memref<1x8x32xbf16, #tpu.memory_space<vmem>>, %arg5: memref<32x32xbf16, #tpu.memory_space<vmem>>, %arg6: memref<32x32xbf16, #tpu.memory_space<vmem>>, %arg7: memref<32x32xbf16, #tpu.memory_space<vmem>>, %arg8: memref<32x32xbf16, #tpu.memory_space<vmem>>, %arg9: memref<1x32xf32, #tpu.memory_space<vmem>>, %arg10: memref<1x8x32xf32, #tpu.memory_space<vmem>>, %arg11: memref<8x32xbf16, #tpu.memory_space<vmem>>, %arg12: memref<8x32xbf16, #tpu.memory_space<vmem>>, %arg13: memref<8x32xbf16, #tpu.memory_space<vmem>>) attributes {dimension_semantics = [#tpu.dimension_semantics<parallel>, #tpu.dimension_semantics<arbitrary>], iteration_bounds = array<i64: 2, 1>, scalar_prefetch = 0 : i64, scratch_operands = 3 : i64, tpu.core_type = #tpu.core_type<tc>, window_params = [{transform_indices = @transform_0, window_bounds = array<i64: 1, 8, 32>}, {transform_indices = @transform_1, window_bounds = array<i64: 1, 8, 32>}, {transform_indices = @transform_2, window_bounds = array<i64: 1, 8, 32>}, {pipeline_mode = #tpu.pipeline_mode<synchronous>, transform_indices = @transform_3, window_bounds = array<i64: 32, 32>}, {pipeline_mode = #tpu.pipeline_mode<synchronous>, transform_indices = @transform_4, window_bounds = array<i64: 32, 32>}, {pipeline_mode = #tpu.pipeline_mode<synchronous>, transform_indices = @transform_5, window_bounds = array<i64: 32, 32>}, {pipeline_mode = #tpu.pipeline_mode<synchronous>, transform_indices = @transform_6, window_bounds = array<i64: 32, 32>}, {pipeline_mode = #tpu.pipeline_mode<synchronous>, transform_indices = @transform_7, window_bounds = array<i64: 1, 32>}, {transform_indices = @transform_8, window_bounds = array<i64: 1, 8, 32>}]} {
    %c0_i32 = arith.constant 0 : i32
    %0 = arith.cmpi eq, %arg1, %c0_i32 : i32
    %1 = arith.extui %0 : i1 to i32
    %c0_i32_0 = arith.constant 0 : i32
    %2 = arith.cmpi ne, %1, %c0_i32_0 : i32
    scf.if %2 {
      %c0_40 = arith.constant 0 : index
      %c0_41 = arith.constant 0 : index
      %c0_42 = arith.constant 0 : index
      %91 = vector.load %arg3[%c0_40, %c0_41, %c0_42] : memref<1x8x32xbf16, #tpu.memory_space<vmem>>, vector<1x8x32xbf16>
      %92 = vector.shape_cast %91 : vector<1x8x32xbf16> to vector<8x32xbf16>
      %c0_43 = arith.constant 0 : index
      %c0_44 = arith.constant 0 : index
      %93 = vector.load %arg6[%c0_43, %c0_44] : memref<32x32xbf16, #tpu.memory_space<vmem>>, vector<32x32xbf16>
      %cst_45 = arith.constant dense<0.000000e+00> : vector<8x32xf32>
      %94 = tpu.matmul %92, %93, %cst_45 {dimension_numbers = #tpu.dot_dimension_numbers<[1], [0], [0], [1], [0, 0, 1, 1], [], []>} : vector<8x32xbf16>, vector<32x32xbf16>, vector<8x32xf32> -> vector<8x32xf32>
      %95 = arith.truncf %94 : vector<8x32xf32> to vector<8x32xbf16>
      %c0_46 = arith.constant 0 : index
      %c0_47 = arith.constant 0 : index
      %96 = vector.load %arg11[%c0_46, %c0_47] : memref<8x32xbf16, #tpu.memory_space<vmem>>, vector<8x32xbf16>
      tpu.vector_store %arg11[%c0_46, %c0_47], %95 {strides = array<i32>} : memref<8x32xbf16, #tpu.memory_space<vmem>>, vector<8x32xbf16>,
      %c0_48 = arith.constant 0 : index
      %c0_49 = arith.constant 0 : index
      %c0_50 = arith.constant 0 : index
      %97 = vector.load %arg4[%c0_48, %c0_49, %c0_50] : memref<1x8x32xbf16, #tpu.memory_space<vmem>>, vector<1x8x32xbf16>
      %98 = vector.shape_cast %97 : vector<1x8x32xbf16> to vector<8x32xbf16>
      %c0_51 = arith.constant 0 : index
      %c0_52 = arith.constant 0 : index
      %99 = vector.load %arg7[%c0_51, %c0_52] : memref<32x32xbf16, #tpu.memory_space<vmem>>, vector<32x32xbf16>
      %cst_53 = arith.constant dense<0.000000e+00> : vector<8x32xf32>
      %100 = tpu.matmul %98, %99, %cst_53 {dimension_numbers = #tpu.dot_dimension_numbers<[1], [0], [0], [1], [0, 0, 1, 1], [], []>} : vector<8x32xbf16>, vector<32x32xbf16>, vector<8x32xf32> -> vector<8x32xf32>
      %101 = arith.truncf %100 : vector<8x32xf32> to vector<8x32xbf16>
      %c0_54 = arith.constant 0 : index
      %c0_55 = arith.constant 0 : index
      %102 = vector.load %arg12[%c0_54, %c0_55] : memref<8x32xbf16, #tpu.memory_space<vmem>>, vector<8x32xbf16>
      tpu.vector_store %arg12[%c0_54, %c0_55], %101 {strides = array<i32>} : memref<8x32xbf16, #tpu.memory_space<vmem>>, vector<8x32xbf16>,
    } else {
    }
    %c0 = arith.constant 0 : index
    %c0_1 = arith.constant 0 : index
    %c0_2 = arith.constant 0 : index
    %3 = vector.load %arg2[%c0, %c0_1, %c0_2] : memref<1x8x32xbf16, #tpu.memory_space<vmem>>, vector<1x8x32xbf16>
    %4 = vector.shape_cast %3 : vector<1x8x32xbf16> to vector<8x32xbf16>
    %c0_3 = arith.constant 0 : index
    %c0_4 = arith.constant 0 : index
    %5 = vector.load %arg5[%c0_3, %c0_4] : memref<32x32xbf16, #tpu.memory_space<vmem>>, vector<32x32xbf16>
    %cst = arith.constant dense<0.000000e+00> : vector<8x32xf32>
    %6 = tpu.matmul %4, %5, %cst {dimension_numbers = #tpu.dot_dimension_numbers<[1], [0], [0], [1], [0, 0, 1, 1], [], []>} : vector<8x32xbf16>, vector<32x32xbf16>, vector<8x32xf32> -> vector<8x32xf32>
    %7 = arith.truncf %6 : vector<8x32xf32> to vector<8x32xbf16>
    %c0_5 = arith.constant 0 : index
    %c0_6 = arith.constant 0 : index
    %8 = vector.load %arg11[%c0_5, %c0_6] : memref<8x32xbf16, #tpu.memory_space<vmem>>, vector<8x32xbf16>
    %c0_7 = arith.constant 0 : index
    %c0_8 = arith.constant 0 : index
    %9 = vector.load %arg12[%c0_7, %c0_8] : memref<8x32xbf16, #tpu.memory_space<vmem>>, vector<8x32xbf16>
    %10 = vector.extract_strided_slice %7 {offsets = [0, 0], sizes = [8, 8], strides = [1, 1]} : vector<8x32xbf16> to vector<8x8xbf16>
    %11 = vector.extract_strided_slice %8 {offsets = [0, 0], sizes = [8, 8], strides = [1, 1]} : vector<8x32xbf16> to vector<8x8xbf16>
    %12 = vector.extract_strided_slice %9 {offsets = [0, 0], sizes = [8, 8], strides = [1, 1]} : vector<8x32xbf16> to vector<8x8xbf16>
    %cst_9 = arith.constant dense<0.000000e+00> : vector<8x8xf32>
    %13 = tpu.matmul %10, %11, %cst_9 {dimension_numbers = #tpu.dot_dimension_numbers<[1], [1], [0], [0], [0, 0, 1, 0], [], []>} : vector<8x8xbf16>, vector<8x8xbf16>, vector<8x8xf32> -> vector<8x8xf32>
    %cst_10 = arith.constant dense<0xFF800000> : vector<8xf32>
    %14 = vector.multi_reduction <maximumf>, %13, %cst_10 [1] : vector<8x8xf32> to vector<8xf32>
    %15 = vector.shape_cast %14 : vector<8xf32> to vector<8x1xf32>
    %16 = vector.broadcast %15 : vector<8x1xf32> to vector<8x8xf32>
    %17 = arith.subf %13, %16 : vector<8x8xf32>
    %18 = math.exp %17 : vector<8x8xf32>
    %cst_11 = arith.constant dense<0.000000e+00> : vector<8xf32>
    %19 = vector.multi_reduction <add>, %18, %cst_11 [1] : vector<8x8xf32> to vector<8xf32>
    %20 = vector.shape_cast %19 : vector<8xf32> to vector<8x1xf32>
    %21 = arith.truncf %18 : vector<8x8xf32> to vector<8x8xbf16>
    %cst_12 = arith.constant dense<0.000000e+00> : vector<8x8xf32>
    %22 = tpu.matmul %21, %12, %cst_12 {dimension_numbers = #tpu.dot_dimension_numbers<[1], [0], [0], [1], [0, 0, 1, 1], [], []>} : vector<8x8xbf16>, vector<8x8xbf16>, vector<8x8xf32> -> vector<8x8xf32>
    %23 = tpu.reciprocal %20 {approx = true} : vector<8x1xf32> -> vector<8x1xf32>
    %24 = vector.broadcast %23 : vector<8x1xf32> to vector<8x8xf32>
    %25 = arith.mulf %22, %24 : vector<8x8xf32>
    %26 = arith.truncf %25 : vector<8x8xf32> to vector<8x8xbf16>
    %c0_13 = arith.constant 0 : index
    %c0_14 = arith.constant 0 : index
    %27 = vector.load %arg13[%c0_13, %c0_14] : memref<8x32xbf16, #tpu.memory_space<vmem>>, vector<8x8xbf16>
    tpu.vector_store %arg13[%c0_13, %c0_14], %26 {strides = array<i32>} : memref<8x32xbf16, #tpu.memory_space<vmem>>, vector<8x8xbf16>,
    %28 = vector.extract_strided_slice %7 {offsets = [0, 8], sizes = [8, 8], strides = [1, 1]} : vector<8x32xbf16> to vector<8x8xbf16>
    %29 = vector.extract_strided_slice %8 {offsets = [0, 8], sizes = [8, 8], strides = [1, 1]} : vector<8x32xbf16> to vector<8x8xbf16>
    %30 = vector.extract_strided_slice %9 {offsets = [0, 8], sizes = [8, 8], strides = [1, 1]} : vector<8x32xbf16> to vector<8x8xbf16>
    %cst_15 = arith.constant dense<0.000000e+00> : vector<8x8xf32>
    %31 = tpu.matmul %28, %29, %cst_15 {dimension_numbers = #tpu.dot_dimension_numbers<[1], [1], [0], [0], [0, 0, 1, 0], [], []>} : vector<8x8xbf16>, vector<8x8xbf16>, vector<8x8xf32> -> vector<8x8xf32>
    %cst_16 = arith.constant dense<0xFF800000> : vector<8xf32>
    %32 = vector.multi_reduction <maximumf>, %31, %cst_16 [1] : vector<8x8xf32> to vector<8xf32>
    %33 = vector.shape_cast %32 : vector<8xf32> to vector<8x1xf32>
    %34 = vector.broadcast %33 : vector<8x1xf32> to vector<8x8xf32>
    %35 = arith.subf %31, %34 : vector<8x8xf32>
    %36 = math.exp %35 : vector<8x8xf32>
    %cst_17 = arith.constant dense<0.000000e+00> : vector<8xf32>
    %37 = vector.multi_reduction <add>, %36, %cst_17 [1] : vector<8x8xf32> to vector<8xf32>
    %38 = vector.shape_cast %37 : vector<8xf32> to vector<8x1xf32>
    %39 = arith.truncf %36 : vector<8x8xf32> to vector<8x8xbf16>
    %cst_18 = arith.constant dense<0.000000e+00> : vector<8x8xf32>
    %40 = tpu.matmul %39, %30, %cst_18 {dimension_numbers = #tpu.dot_dimension_numbers<[1], [0], [0], [1], [0, 0, 1, 1], [], []>} : vector<8x8xbf16>, vector<8x8xbf16>, vector<8x8xf32> -> vector<8x8xf32>
    %41 = tpu.reciprocal %38 {approx = true} : vector<8x1xf32> -> vector<8x1xf32>
    %42 = vector.broadcast %41 : vector<8x1xf32> to vector<8x8xf32>
    %43 = arith.mulf %40, %42 : vector<8x8xf32>
    %44 = arith.truncf %43 : vector<8x8xf32> to vector<8x8xbf16>
    %c0_19 = arith.constant 0 : index
    %c8 = arith.constant 8 : index
    %45 = vector.load %arg13[%c0_19, %c8] : memref<8x32xbf16, #tpu.memory_space<vmem>>, vector<8x8xbf16>
    tpu.vector_store %arg13[%c0_19, %c8], %44 {strides = array<i32>} : memref<8x32xbf16, #tpu.memory_space<vmem>>, vector<8x8xbf16>,
    %46 = vector.extract_strided_slice %7 {offsets = [0, 16], sizes = [8, 8], strides = [1, 1]} : vector<8x32xbf16> to vector<8x8xbf16>
    %47 = vector.extract_strided_slice %8 {offsets = [0, 16], sizes = [8, 8], strides = [1, 1]} : vector<8x32xbf16> to vector<8x8xbf16>
    %48 = vector.extract_strided_slice %9 {offsets = [0, 16], sizes = [8, 8], strides = [1, 1]} : vector<8x32xbf16> to vector<8x8xbf16>
    %cst_20 = arith.constant dense<0.000000e+00> : vector<8x8xf32>
    %49 = tpu.matmul %46, %47, %cst_20 {dimension_numbers = #tpu.dot_dimension_numbers<[1], [1], [0], [0], [0, 0, 1, 0], [], []>} : vector<8x8xbf16>, vector<8x8xbf16>, vector<8x8xf32> -> vector<8x8xf32>
    %cst_21 = arith.constant dense<0xFF800000> : vector<8xf32>
    %50 = vector.multi_reduction <maximumf>, %49, %cst_21 [1] : vector<8x8xf32> to vector<8xf32>
    %51 = vector.shape_cast %50 : vector<8xf32> to vector<8x1xf32>
    %52 = vector.broadcast %51 : vector<8x1xf32> to vector<8x8xf32>
    %53 = arith.subf %49, %52 : vector<8x8xf32>
    %54 = math.exp %53 : vector<8x8xf32>
    %cst_22 = arith.constant dense<0.000000e+00> : vector<8xf32>
    %55 = vector.multi_reduction <add>, %54, %cst_22 [1] : vector<8x8xf32> to vector<8xf32>
    %56 = vector.shape_cast %55 : vector<8xf32> to vector<8x1xf32>
    %57 = arith.truncf %54 : vector<8x8xf32> to vector<8x8xbf16>
    %cst_23 = arith.constant dense<0.000000e+00> : vector<8x8xf32>
    %58 = tpu.matmul %57, %48, %cst_23 {dimension_numbers = #tpu.dot_dimension_numbers<[1], [0], [0], [1], [0, 0, 1, 1], [], []>} : vector<8x8xbf16>, vector<8x8xbf16>, vector<8x8xf32> -> vector<8x8xf32>
    %59 = tpu.reciprocal %56 {approx = true} : vector<8x1xf32> -> vector<8x1xf32>
    %60 = vector.broadcast %59 : vector<8x1xf32> to vector<8x8xf32>
    %61 = arith.mulf %58, %60 : vector<8x8xf32>
    %62 = arith.truncf %61 : vector<8x8xf32> to vector<8x8xbf16>
    %c0_24 = arith.constant 0 : index
    %c16 = arith.constant 16 : index
    %63 = vector.load %arg13[%c0_24, %c16] : memref<8x32xbf16, #tpu.memory_space<vmem>>, vector<8x8xbf16>
    tpu.vector_store %arg13[%c0_24, %c16], %62 {strides = array<i32>} : memref<8x32xbf16, #tpu.memory_space<vmem>>, vector<8x8xbf16>,
    %64 = vector.extract_strided_slice %7 {offsets = [0, 24], sizes = [8, 8], strides = [1, 1]} : vector<8x32xbf16> to vector<8x8xbf16>
    %65 = vector.extract_strided_slice %8 {offsets = [0, 24], sizes = [8, 8], strides = [1, 1]} : vector<8x32xbf16> to vector<8x8xbf16>
    %66 = vector.extract_strided_slice %9 {offsets = [0, 24], sizes = [8, 8], strides = [1, 1]} : vector<8x32xbf16> to vector<8x8xbf16>
    %cst_25 = arith.constant dense<0.000000e+00> : vector<8x8xf32>
    %67 = tpu.matmul %64, %65, %cst_25 {dimension_numbers = #tpu.dot_dimension_numbers<[1], [1], [0], [0], [0, 0, 1, 0], [], []>} : vector<8x8xbf16>, vector<8x8xbf16>, vector<8x8xf32> -> vector<8x8xf32>
    %cst_26 = arith.constant dense<0xFF800000> : vector<8xf32>
    %68 = vector.multi_reduction <maximumf>, %67, %cst_26 [1] : vector<8x8xf32> to vector<8xf32>
    %69 = vector.shape_cast %68 : vector<8xf32> to vector<8x1xf32>
    %70 = vector.broadcast %69 : vector<8x1xf32> to vector<8x8xf32>
    %71 = arith.subf %67, %70 : vector<8x8xf32>
    %72 = math.exp %71 : vector<8x8xf32>
    %cst_27 = arith.constant dense<0.000000e+00> : vector<8xf32>
    %73 = vector.multi_reduction <add>, %72, %cst_27 [1] : vector<8x8xf32> to vector<8xf32>
    %74 = vector.shape_cast %73 : vector<8xf32> to vector<8x1xf32>
    %75 = arith.truncf %72 : vector<8x8xf32> to vector<8x8xbf16>
    %cst_28 = arith.constant dense<0.000000e+00> : vector<8x8xf32>
    %76 = tpu.matmul %75, %66, %cst_28 {dimension_numbers = #tpu.dot_dimension_numbers<[1], [0], [0], [1], [0, 0, 1, 1], [], []>} : vector<8x8xbf16>, vector<8x8xbf16>, vector<8x8xf32> -> vector<8x8xf32>
    %77 = tpu.reciprocal %74 {approx = true} : vector<8x1xf32> -> vector<8x1xf32>
    %78 = vector.broadcast %77 : vector<8x1xf32> to vector<8x8xf32>
    %79 = arith.mulf %76, %78 : vector<8x8xf32>
    %80 = arith.truncf %79 : vector<8x8xf32> to vector<8x8xbf16>
    %c0_29 = arith.constant 0 : index
    %c24 = arith.constant 24 : index
    %81 = vector.load %arg13[%c0_29, %c24] : memref<8x32xbf16, #tpu.memory_space<vmem>>, vector<8x8xbf16>
    tpu.vector_store %arg13[%c0_29, %c24], %80 {strides = array<i32>} : memref<8x32xbf16, #tpu.memory_space<vmem>>, vector<8x8xbf16>,
    %c0_30 = arith.constant 0 : index
    %c0_31 = arith.constant 0 : index
    %82 = vector.load %arg13[%c0_30, %c0_31] : memref<8x32xbf16, #tpu.memory_space<vmem>>, vector<8x32xbf16>
    %c0_32 = arith.constant 0 : index
    %c0_33 = arith.constant 0 : index
    %83 = vector.load %arg8[%c0_32, %c0_33] : memref<32x32xbf16, #tpu.memory_space<vmem>>, vector<32x32xbf16>
    %cst_34 = arith.constant dense<0.000000e+00> : vector<8x32xf32>
    %84 = tpu.matmul %82, %83, %cst_34 {dimension_numbers = #tpu.dot_dimension_numbers<[1], [0], [0], [1], [0, 0, 1, 1], [], []>} : vector<8x32xbf16>, vector<32x32xbf16>, vector<8x32xf32> -> vector<8x32xf32>
    %c0_35 = arith.constant 0 : index
    %c0_36 = arith.constant 0 : index
    %85 = vector.load %arg9[%c0_35, %c0_36] : memref<1x32xf32, #tpu.memory_space<vmem>>, vector<1x32xf32>
    %86 = vector.broadcast %85 : vector<1x32xf32> to vector<8x32xf32>
    %87 = arith.addf %84, %86 : vector<8x32xf32>
    %c0_37 = arith.constant 0 : index
    %c0_38 = arith.constant 0 : index
    %c0_39 = arith.constant 0 : index
    %88 = vector.load %arg10[%c0_37, %c0_38, %c0_39] : memref<1x8x32xf32, #tpu.memory_space<vmem>>, vector<1x8x32xf32>
    %89 = vector.shape_cast %88 : vector<1x8x32xf32> to vector<8x32xf32>
    %90 = vector.shape_cast %87 : vector<8x32xf32> to vector<1x8x32xf32>
    tpu.vector_store %arg10[%c0_37, %c0_38, %c0_39], %90 {strides = array<i32>} : memref<1x8x32xf32, #tpu.memory_space<vmem>>, vector<1x8x32xf32>,
    return
  }
  func.func @transform_0(%arg0: i32, %arg1: i32) -> (i32, i32, i32) {
    %c0_i32 = arith.constant 0 : i32
    %c0_i32_0 = arith.constant 0 : i32
    return %arg0, %arg1, %c0_i32 : i32, i32, i32
  }
  func.func @transform_1(%arg0: i32, %arg1: i32) -> (i32, i32, i32) {
    %c0_i32 = arith.constant 0 : i32
    %c0_i32_0 = arith.constant 0 : i32
    %c0_i32_1 = arith.constant 0 : i32
    return %arg0, %c0_i32, %c0_i32_0 : i32, i32, i32
  }
  func.func @transform_2(%arg0: i32, %arg1: i32) -> (i32, i32, i32) {
    %c0_i32 = arith.constant 0 : i32
    %c0_i32_0 = arith.constant 0 : i32
    %c0_i32_1 = arith.constant 0 : i32
    return %arg0, %c0_i32, %c0_i32_0 : i32, i32, i32
  }
  func.func @transform_3(%arg0: i32, %arg1: i32) -> (i32, i32) {
    %c0_i32 = arith.constant 0 : i32
    %c0_i32_0 = arith.constant 0 : i32
    %c0_i32_1 = arith.constant 0 : i32
    return %c0_i32, %c0_i32_0 : i32, i32
  }
  func.func @transform_4(%arg0: i32, %arg1: i32) -> (i32, i32) {
    %c0_i32 = arith.constant 0 : i32
    %c0_i32_0 = arith.constant 0 : i32
    %c0_i32_1 = arith.constant 0 : i32
    return %c0_i32, %c0_i32_0 : i32, i32
  }
  func.func @transform_5(%arg0: i32, %arg1: i32) -> (i32, i32) {
    %c0_i32 = arith.constant 0 : i32
    %c0_i32_0 = arith.constant 0 : i32
    %c0_i32_1 = arith.constant 0 : i32
    return %c0_i32, %c0_i32_0 : i32, i32
  }
  func.func @transform_6(%arg0: i32, %arg1: i32) -> (i32, i32) {
    %c0_i32 = arith.constant 0 : i32
    %c0_i32_0 = arith.constant 0 : i32
    %c0_i32_1 = arith.constant 0 : i32
    return %c0_i32, %c0_i32_0 : i32, i32
  }
  func.func @transform_7(%arg0: i32, %arg1: i32) -> (i32, i32) {
    %c0_i32 = arith.constant 0 : i32
    %c0_i32_0 = arith.constant 0 : i32
    %c0_i32_1 = arith.constant 0 : i32
    return %c0_i32, %c0_i32_0 : i32, i32
  }
  func.func @transform_8(%arg0: i32, %arg1: i32) -> (i32, i32, i32) {
    %c0_i32 = arith.constant 0 : i32
    %c0_i32_0 = arith.constant 0 : i32
    return %arg0, %arg1, %c0_i32 : i32, i32, i32
  }
}

</mosaic_0001>

<bundles_post_ra>
// kernel: tpu_custom_call.1
= control target key start
LH: loop header
LB: loop body
LE: loop exit
PB: predicated region body
PF: predicated region fallthrough
CT: control target
= control target key end

     0   :  { %s2422_s0 = inlined_call_operand.hbm [shape: bf16[2,8,32], index: 0, kind: input, shape index: {}]   ;;  %s2423_s1 = inlined_call_operand.hbm [shape: bf16[2,8,32], index: 1, kind: input, shape index: {}]   ;;  %s2424_s2 = inlined_call_operand.hbm [shape: bf16[2,8,32], index: 2, kind: input, shape index: {}]   ;;  %s2425_s3 = inlined_call_operand.hbm [shape: bf16[32,32], index: 3, kind: input, shape index: {}]   ;;  %s2426_s4 = inlined_call_operand.hbm [shape: bf16[32,32], index: 4, kind: input, shape index: {}]   ;;  %s2427_s5 = inlined_call_operand.vmem [shape: bf16[32,32], index: 5, kind: input, shape index: {}]   ;;  %s2428_s6 = inlined_call_operand.hbm [shape: bf16[32,32], index: 6, kind: input, shape index: {}]   ;;  %s2429_s7 = inlined_call_operand.vmem [shape: f32[1,32], index: 7, kind: input, shape index: {}]   ;;  %s2430_s8 = inlined_call_operand.hbm [shape: f32[2,8,32], index: 8, kind: output, shape index: {}]  }
   0x1   :  { %2457 = sst [smem:[#allocation30_spill]] %s2423_s1 }
   0x2   :  { %2458 = sst [smem:[#allocation31_spill]] %s2425_s3 }
   0x3   :  { %2459 = sst [smem:[#allocation32_spill]] %s2429_s7 }
   0x4   :  { %2460 = sst [smem:[#allocation33_spill]] %s2430_s8 }
   0x5   :  { %13 = vsyncpa [#allocation6], 0 }
   0x6   :  { %15 = vsyncpa [#allocation6 + $0x1], 0 }
   0x7   :  { %16 = vsyncpa [#allocation9], 0 }
   0x8   :  { %18 = vsyncpa [#allocation9 + $0x1], 0 }
   0x9   :  { %19 = vsyncpa [#allocation12], 0 }
   0xa   :  { %20 = vsyncpa [#allocation15], 0 }
   0xb   :  { %21 = vsyncpa [#allocation7], 0 }
   0xc   :  { %23 = vsyncpa [#allocation7 + $0x1], 0  ;;  %s1989_s27 = smov 0   ;;  %s1991_s28 = smov 0  }
   0xd   :  { %s1993_s29 = smov 0   ;;  %s1995_s30 = smov 0  }
   0xe   :  { %s1997_s9 = smov 0   ;;  %s1999_s10 = smov 0  }
   0xf LB: > { %2461 = sst [smem:[#allocation22_spill]] %s1905_s27  ;;  %s2020_s11 = sadd.s32 4294967295, %s1925_s10   ;;  %s1925_s10 = sphi %s1999_s10, %s29_s10   ;;  %s1921_s9 = sphi %s1997_s9, %s2506_s9   ;;  %s1917_s30 = sphi %s1995_s30, %s2505_s30   ;;  %s1913_s29 = sphi %s1993_s29, %s2509_s29   ;;  %s1909_s28 = sphi %s1991_s28, %s2508_s28   ;;  %s1905_s27 = sphi %s1989_s27, %s2507_s27  }
  0x10   : > { %2462 = sst [smem:[#allocation23_spill]] %s1917_s30  ;;  %s1357_s12 = sadd.s32 4294967294, %s1925_s10  }
  0x11   : > { %2463 = sst [smem:[#allocation24_spill]] %s1921_s9  ;;  %p63_p0 = scmp.ne.s32.totalorder %s1909_s28, %s1905_s27 }
  0x12   : > { %2464 = sst [smem:[#allocation25_spill]] %s1925_s10  ;;  %p2431_p1 = scmp.eq.s32.totalorder %s2020_s11, 0 }
  0x13   : > { %p252_p3 = scmp.eq.s32.totalorder %s1357_s12, 1  ;;  %p1358_p5 = scmp.ge.s32.totalorder %s1925_s10, 1 }
  0x14   : > { %p2029_p4 = por %p2431_p1, %p63_p0  ;;  %p259_p7 = scmp.lt.s32.totalorder %s1925_s10, 3 }
  0x15   : > { %p2034_p6 = por %p252_p3, %p63_p0  ;;  %s1927_s16 = smov [#allocation11]  }
  0x16   : > { %s2465_s13 = scalar_select %p2029_p4, 1, 0 }
  0x17   : > { %s2466_s14 = scalar_select %p2034_p6, 1, 0 }
  0x18   : > { %p2039_p8 = pnand %p1358_p5, %p259_p7  ;;  %s271_s17 = sshll.u32 %s1927_s16, 4  ;;  %s272_s17 = int_to_ptr.vmem [resolvable:$true] %s271_s17 }
  0x19   : > { %2467 = sst [smem:[#allocation26_spill]] %s2466_s14  ;;  %s41_s19 = sadd.s32 1, %s1921_s9 }
  0x1a   : > { %s2468_s15 = scalar_select %p2039_p8, 1, 0 }
  0x1b   : > { %p1538_p9 = pneg %p2039_p8  ;;  %s2470_s3 = sld [smem:[#allocation31_spill]] }
  0x1d   : > { %p2048_p11 = pnand %p1538_p9, %p2431_p1 }
  0x1f   : > { %s2469_s18 = scalar_select %p2048_p11, 1, 0 }
  0x20   : > { %p2061_p13 = pneg %p2048_p11 }
  0x21   : > { %s1657_s22 = scalar_lea.hbm %s2470_s3, 256 }
  0x22   : > { %p1658_p12 = scmp.ne.s32.totalorder %s2470_s3, %s1657_s22  ;;  %p1664_p5 = scmp.lt.u32.totalorder %s1657_s22, %s2470_s3 }
  0x23   : > { %s2471_s25 = scalar_select %p2061_p13, 1, 0 }
  0x24   : > { %p1660_p0 = pnand %p2061_p13, %p1658_p12 }
  0x26   : > { %p1661_p3 = pneg %p1660_p0 }
  0x28   : > { %p1666_p7 = pnand %p1664_p5, %p1661_p3 }
  0x2a   : > { %1669 = shalt.err (!%p1666_p7)
}
  0x2b   : > { %s1670_s16 = scalar_lea.vmem %s272_s17, 256  ;;  %p1678_p2 = scmp.lt.s32.totalorder %s272_s17, %s272_s17 }
  0x2c   : > { %p1671_p9 = scmp.ne.s32.totalorder %s272_s17, %s1670_s16  ;;  %p1679_p6 = scmp.lt.s32.totalorder %s1670_s16, %s1670_s16 }
  0x2e   : > { %p1673_p10 = pnand %p1671_p9, %p2061_p13  ;;  %p1680_p4 = por %p1679_p6, %p1678_p2 }
  0x30   : > { %p1674_p1 = pneg %p1673_p10 }
  0x32   : > { %p1681_p8 = pnand %p1680_p4, %p1674_p1 }
  0x34   : > { %1684 = shalt.err (!%p1681_p8)
}
  0x35   : > { %s2434_s20 = smov 64   ;;  %s2436_s21 = smov 4  }
  0x36   : > { %1541 = dma.hbm_to_vmem [thread:$0]  (!%p2048_p11), %s2470_s3, 256, %s272_s17, [#allocation12], %s2434_s20, %s2434_s20, %s2436_s21  }
  0x37   : > { %p43_p1 = scmp.ge.s32.totalorder %s41_s19, 2  ;;  %s50_s24 = sadd.s32 1, %s1913_s29 }
  0x38   : > { %p57_p2 = scmp.ne.s32.totalorder %s1913_s29, %s1909_s28  ;;  %p58_p4 = scmp.eq.s32.totalorder %s1925_s10, 0 }
  0x39   : > { %s2511_s19 = smov (%p43_p1, %s41_s19), 0  ;;  %p2473_p8 = scmp.eq.s32.totalorder %s2020_s11, 1 }
  0x3a   : > { %2472 = sst [smem:[#allocation27_spill]] %s2511_s19  ;;  %p59_p6 = por %p58_p4, %p57_p2 }
  0x3b   : > { %p2088_p10 = por %p2473_p8, %p57_p2  ;;  %s45_s12 = ssub.s32 %s1921_s9, %s2511_s19 }
  0x3c   : > { %p1565_p12 = scmp.lt.s32.totalorder %s1925_s10, 2  ;;  %p48_p0 = scmp.eq.s32.totalorder %s45_s12, 0 }
  0x3d   : > { %s2474_s26 = scalar_select %p2088_p10, 1, 0 }
  0x3e   : > { %s2439_s16 = sand.u32 1, %s1913_s29   ;;  %s2101_s22 = sshll.u32 %s1921_s9, 6 }
  0x3f   : > { %2475 = sst [smem:[#allocation28_spill]] %s2474_s26  ;;  %s2098_s17 = sshll.u32 %s2439_s16, 2 }
  0x40   : > { %s2104_s23 = scalar_select %p48_p0, %s1913_s29, %s50_s24  }
  0x41   : > { %p2106_p3 = pnand %p1565_p12, %p59_p6  ;;  %s336_s21 = sand.u32 1, %s1925_s10  }
  0x42   : > { %2476 = sst [smem:[#allocation29_spill]] %s2104_s23  ;;  %s2478_s1 = sld [smem:[#allocation30_spill]] }
  0x43   : > { %s2477_s20 = scalar_select %p2106_p3, 1, 0 }
  0x44   : > { %s340_s16 = scalar_lea.vmem [#allocation8], %s2098_s17  ;;  %s1930_s24 = smov [#allocation13]  }
  0x45   : > { %s347_s9 = sshll.u32 %s340_s16, 4  ;;  %s2120_s23 = sshll.u32 %s1930_s24, 4  ;;  %s2118_s9 = int_to_ptr.vmem [resolvable:$true] %s347_s9  ;;  %s285_s23 = int_to_ptr.vmem [resolvable:$true] %s2120_s23 }
  0x46   : > { %s2122_s14 = scalar_lea.sflag [#allocation9], %s336_s21  ;;  %p2128_p7 = pneg %p2106_p3 }
  0x48   : > { %s2115_s12 = scalar_lea.hbm %s2478_s1, %s2101_s22  ;;  %s1690_s10 = scalar_lea.hbm %s2478_s1, 128 }
  0x49   : > { %s1685_s27 = scalar_lea.hbm %s2115_s12, 64  ;;  %p1691_p2 = scmp.lt.u32.totalorder %s2115_s12, %s2478_s1 }
  0x4a   : > { %p1686_p5 = scmp.ne.s32.totalorder %s2115_s12, %s1685_s27  ;;  %p1692_p4 = scmp.lt.u32.totalorder %s1690_s10, %s1685_s27 }
  0x4b   : > { %s2479_s3 = scalar_select %p2128_p7, 1, 0 }
  0x4c   : > { %p1688_p9 = pnand %p2128_p7, %p1686_p5  ;;  %p1693_p6 = por %p1692_p4, %p1691_p2 }
  0x4d   : > { %p1694_p8 = scmp.lt.u32.totalorder %s1685_s27, %s2115_s12 }
  0x4e   : > { %p1689_p1 = pneg %p1688_p9 }
  0x4f   : > { %p1695_p12 = por %p1694_p8, %p1693_p6 }
  0x51   : > { %p1696_p0 = pnand %p1695_p12, %p1689_p1 }
  0x53   : > { %1699 = shalt.err (!%p1696_p0)
}
  0x54   : > { %s1700_s21 = scalar_lea.vmem %s2118_s9, 64  ;;  %s1931_s19 = smov [#allocation8]  }
  0x55   : > { %p1701_p5 = scmp.ne.s32.totalorder %s2118_s9, %s1700_s21  ;;  %s1705_s16 = sshll.u32 %s1931_s19, 4  ;;  %s1706_s16 = int_to_ptr.vmem [resolvable:$false] %s1705_s16 }
  0x56   : > { %s1707_s8 = scalar_lea.vmem %s1706_s16, 128  ;;  %p1708_p11 = scmp.lt.s32.totalorder %s2118_s9, %s1706_s16 }
  0x57   : > { %p1703_p9 = pnand %p1701_p5, %p2128_p7  ;;  %p1709_p13 = scmp.lt.s32.totalorder %s1707_s8, %s1700_s21 }
  0x59   : > { %p1704_p10 = pneg %p1703_p9  ;;  %p1710_p2 = por %p1709_p13, %p1708_p11 }
  0x5b   : > { %p1711_p4 = pnand %p1710_p2, %p1704_p10 }
  0x5d   : > { %1714 = shalt.err (!%p1711_p4)
}
  0x5e   : > { %1554 = dma.hbm_to_vmem [thread:$0]  (!%p2106_p3), %s2115_s12, 64, %s2118_s9, %s2122_s14  }
  0x5f   : > { %s1715_s24 = scalar_lea.hbm %s2426_s4, 256  ;;  %p2480_p11 = scmp.ne.s32.totalorder %s2471_s25, 0 }
  0x60   : > { %p1716_p1 = scmp.ne.s32.totalorder %s2426_s4, %s1715_s24  ;;  %p1722_p6 = scmp.lt.u32.totalorder %s1715_s24, %s2426_s4 }
  0x62   : > { %p1718_p13 = pnand %p1716_p1, %p2480_p11 }
  0x64   : > { %p1719_p10 = pneg %p1718_p13 }
  0x66   : > { %p1724_p8 = pnand %p1722_p6, %p1719_p10 }
  0x68   : > { %1727 = shalt.err (!%p1724_p8)
}
  0x69   : > { %s1728_s8 = scalar_lea.vmem %s285_s23, 256  ;;  %p1736_p9 = scmp.lt.s32.totalorder %s285_s23, %s285_s23 }
  0x6a   : > { %p1729_p12 = scmp.ne.s32.totalorder %s285_s23, %s1728_s8  ;;  %p1737_p2 = scmp.lt.s32.totalorder %s1728_s8, %s1728_s8 }
  0x6c   : > { %p1731_p0 = pnand %p1729_p12, %p2480_p11  ;;  %p1738_p4 = por %p1737_p2, %p1736_p9 }
  0x6e   : > { %p1732_p5 = pneg %p1731_p0 }
  0x70   : > { %p1739_p3 = pnand %p1738_p4, %p1732_p5 }
  0x72   : > { %1742 = shalt.err (!%p1739_p3)
}
  0x73   : > { %p2481_p1 = scmp.ne.s32.totalorder %s2469_s18, 0  ;;  %s2482_s1 = smov 4  }
  0x74   : > { %s2483_s9 = smov 64   ;;  %s1932_s10 = smov [#allocation14]  }
  0x75   : > { %1544 = dma.hbm_to_vmem [thread:$0]  (!%p2481_p1), %s2426_s4, 256, %s285_s23, [#allocation12], %s2483_s9, %s2483_s9, %s2482_s1  }
  0x76   : > { %s300_s24 = sshll.u32 %s1932_s10, 4  ;;  %s1743_s16 = scalar_lea.hbm %s2428_s6, 256  ;;  %s301_s24 = int_to_ptr.vmem [resolvable:$true] %s300_s24 }
  0x77   : > { %p1744_p3 = scmp.ne.s32.totalorder %s2428_s6, %s1743_s16  ;;  %p1750_p6 = scmp.lt.u32.totalorder %s1743_s16, %s2428_s6 }
  0x79   : > { %p1746_p13 = pnand %p1744_p3, %p2480_p11 }
  0x7b   : > { %p1747_p10 = pneg %p1746_p13 }
  0x7d   : > { %p1752_p8 = pnand %p1750_p6, %p1747_p10 }
  0x7f   : > { %1755 = shalt.err (!%p1752_p8)
}
  0x80   : > { %s1756_s23 = scalar_lea.vmem %s301_s24, 256  ;;  %p1764_p9 = scmp.lt.s32.totalorder %s301_s24, %s301_s24 }
  0x81   : > { %p1757_p12 = scmp.ne.s32.totalorder %s301_s24, %s1756_s23  ;;  %p1765_p2 = scmp.lt.s32.totalorder %s1756_s23, %s1756_s23 }
  0x83   : > { %p1759_p0 = pnand %p1757_p12, %p2480_p11  ;;  %p1766_p4 = por %p1765_p2, %p1764_p9 }
  0x85   : > { %p1760_p5 = pneg %p1759_p0 }
  0x87   : > { %p1767_p7 = pnand %p1766_p4, %p1760_p5 }
  0x89   : > { %1770 = shalt.err (!%p1767_p7)
}
  0x8a   : > { %1547 = dma.hbm_to_vmem [thread:$0]  (!%p2481_p1), %s2428_s6, 256, %s301_s24, [#allocation15], %s2483_s9, %s2483_s9, %s2482_s1  }
  0x8b   : > { %s2199_s12 = scalar_lea.hbm %s2422_s0, %s2101_s22  ;;  %s321_s18 = scalar_lea.vmem [#allocation5], %s2098_s17 }
  0x8c   : > { %s329_s27 = sshll.u32 %s321_s18, 4  ;;  %s2484_s10 = sand.u32 1, %s1913_s29   ;;  %s330_s27 = int_to_ptr.vmem [resolvable:$true] %s329_s27 }
  0x8d   : > { %s318_s19 = scalar_lea.sflag [#allocation6], %s2484_s10  ;;  %s1771_s21 = scalar_lea.hbm %s2199_s12, 64 }
  0x8e   : > { %p1772_p7 = scmp.ne.s32.totalorder %s2199_s12, %s1771_s21  ;;  %p2485_p11 = scmp.ne.s32.totalorder %s2479_s3, 0 }
  0x8f   : > { %s1776_s24 = scalar_lea.hbm %s2422_s0, 128  ;;  %p1777_p1 = scmp.lt.u32.totalorder %s2199_s12, %s2422_s0 }
  0x90   : > { %p1774_p3 = pnand %p1772_p7, %p2485_p11  ;;  %p1778_p10 = scmp.lt.u32.totalorder %s1776_s24, %s1771_s21 }
  0x91   : > { %p1780_p8 = scmp.lt.u32.totalorder %s1771_s21, %s2199_s12 }
  0x92   : > { %p1775_p13 = pneg %p1774_p3  ;;  %p1779_p6 = por %p1778_p10, %p1777_p1 }
  0x94   : > { %p1781_p12 = por %p1780_p8, %p1779_p6 }
  0x96   : > { %p1782_p0 = pnand %p1781_p12, %p1775_p13 }
  0x98   : > { %1785 = shalt.err (!%p1782_p0)
}
  0x99   : > { %s1786_s23 = scalar_lea.vmem %s330_s27, 64  ;;  %s1933_s7 = smov [#allocation5]  }
  0x9a   : > { %p1787_p5 = scmp.ne.s32.totalorder %s330_s27, %s1786_s23  ;;  %s1791_s30 = sshll.u32 %s1933_s7, 4  ;;  %s1792_s30 = int_to_ptr.vmem [resolvable:$false] %s1791_s30 }
  0x9b   : > { %s1793_s25 = scalar_lea.vmem %s1792_s30, 128  ;;  %p1794_p4 = scmp.lt.s32.totalorder %s330_s27, %s1792_s30 }
  0x9c   : > { %p1789_p9 = pnand %p1787_p5, %p2485_p11  ;;  %p1795_p7 = scmp.lt.s32.totalorder %s1793_s25, %s1786_s23 }
  0x9e   : > { %p1790_p2 = pneg %p1789_p9  ;;  %p1796_p3 = por %p1795_p7, %p1794_p4 }
  0xa0   : > { %p1797_p1 = pnand %p1796_p3, %p1790_p2 }
  0xa2   : > { %1800 = shalt.err (!%p1797_p1)
}
  0xa3   : > { %p2486_p10 = scmp.ne.s32.totalorder %s2477_s20, 0  ;;  %s2225_s10 = scalar_lea.hbm %s2424_s2, %s2101_s22 }
  0xa4   : > { %s358_s21 = scalar_lea.vmem [#allocation10], %s2098_s17  ;;  %s1801_s9 = scalar_lea.hbm %s2225_s10, 64 }
  0xa5   : > { %1551 = dma.hbm_to_vmem [thread:$0]  (!%p2486_p10), %s2199_s12, 64, %s330_s27, %s318_s19  }
  0xa6   : > { %s365_s1 = sshll.u32 %s358_s21, 4  ;;  %p1802_p13 = scmp.ne.s32.totalorder %s2225_s10, %s1801_s9  ;;  %s366_s1 = int_to_ptr.vmem [resolvable:$true] %s365_s1 }
  0xa7   : > { %s1806_s12 = scalar_lea.hbm %s2424_s2, 128  ;;  %p1807_p12 = scmp.lt.u32.totalorder %s2225_s10, %s2424_s2 }
  0xa8   : > { %p1804_p6 = pnand %p1802_p13, %p2485_p11  ;;  %p1808_p0 = scmp.lt.u32.totalorder %s1806_s12, %s1801_s9 }
  0xa9   : > { %p1810_p9 = scmp.lt.u32.totalorder %s1801_s9, %s2225_s10 }
  0xaa   : > { %p1805_p8 = pneg %p1804_p6  ;;  %p1809_p5 = por %p1808_p0, %p1807_p12 }
  0xac   : > { %p1811_p2 = por %p1810_p9, %p1809_p5 }
  0xae   : > { %p1812_p4 = pnand %p1811_p2, %p1805_p8 }
  0xb0   : > { %1815 = shalt.err (!%p1812_p4)
}
  0xb1   : > { %s1816_s17 = scalar_lea.vmem %s366_s1, 64  ;;  %s1934_s22 = smov [#allocation10]  }
  0xb2   : > { %p1817_p7 = scmp.ne.s32.totalorder %s366_s1, %s1816_s17  ;;  %s1821_s8 = sshll.u32 %s1934_s22, 4  ;;  %s1822_s8 = int_to_ptr.vmem [resolvable:$false] %s1821_s8 }
  0xb3   : > { %s1823_s23 = scalar_lea.vmem %s1822_s8, 128  ;;  %p1824_p13 = scmp.lt.s32.totalorder %s366_s1, %s1822_s8 }
  0xb4   : > { %p1819_p3 = pnand %p1817_p7, %p2485_p11  ;;  %p1825_p6 = scmp.lt.s32.totalorder %s1823_s23, %s1816_s17 }
  0xb6   : > { %p1820_p1 = pneg %p1819_p3  ;;  %p1826_p10 = por %p1825_p6, %p1824_p13 }
  0xb8   : > { %p1827_p0 = pnand %p1826_p10, %p1820_p1 }
  0xba   : > { %1830 = shalt.err (!%p1827_p0)
}
  0xbb   : > { %p2487_p12 = scmp.ne.s32.totalorder %s2477_s20, 0  ;;  %p2488_p8 = scmp.ne.s32.totalorder %s2468_s15, 0 }
  0xbc   : > { %s2249_s3 = sand.u32 (!%p2488_p8), 1, %s1909_s28   ;;  %p2489_p11 = scmp.ne.s32.totalorder (!%p2488_p8), %s2465_s13, 0 }
  0xbd   : > { %1557 = dma.hbm_to_vmem [thread:$0]  (!%p2487_p12), %s2225_s10, 64, %s366_s1, %s2122_s14  }
  0xbe   : > { %374 = sbr.rel (%p2488_p8) target bundleno = 1520 (0x5f0), region = 52  ;;  %s2252_s7 = sshll.u32 (!%p2488_p8), %s2249_s3, 2 }
  0xbf   : > { %s377_s30 = scalar_lea.sflag (!%p2488_p8), [#allocation6], %s2249_s3  ;;  %s380_s25 = scalar_lea.vmem (!%p2488_p8), [#allocation5], %s2252_s7 }
  0xc5   : > { %1884 = dma.done.wait (%p2489_p11), %s377_s30, 64  }
  0xc6   : > { %1886 = vsyncadd (%p2489_p11), %s377_s30, 4294967232  ;;  %s385_s14 = sand.u32 1, %s2020_s11   ;;  %s389_s20 = scalar_lea.vmem [#allocation8], %s2252_s7 }
  0xc7   : > { %s386_s15 = scalar_lea.sflag [#allocation9], %s385_s14 }
  0xc8   : > { %1888 = dma.done.wait (%p2489_p11), %s386_s15, 128  }
  0xc9   : > { %1890 = vsyncadd (%p2489_p11), %s386_s15, 4294967168  ;;  %s398_s26 = scalar_lea.vmem [#allocation10], %s2252_s7  ;;  %p2490_p10 = scmp.eq.s32.totalorder %s2020_s11, 0 }
  0xcb   : > { %1892 = dma.done.wait (%p2490_p10), [#allocation12], 512   ;;  %p2491_p5 = pmov %p2490_p10 }
  0xcd   : > { %1894 = vsyncadd (%p2491_p5), [#allocation12], 4294966784  ;;  %p2492_p9 = pmov %p2491_p5 }
  0xce   : > { %p2493_p2 = pmov %p2491_p5 }
  0xcf   : > { %1896 = dma.done.wait (%p2492_p9), [#allocation15], 256  }
  0xd0   : > { %1898 = vsyncadd (%p2493_p2), [#allocation15], 4294967040  ;;  %v1935_v0 = vmov 0.0   ;;  %vm1936_vm0 = vmmov 0   ;;  %v1631_v1 = vld [vmem:[#allocation13] sm:$0xff]   ;;  %v1632_v2 = vld [vmem:[#allocation13 + $0x8] sm:$0xff]  }
  0xd1   : > { %1438 = vmatprep.subr.bf16.mxu0 %v1935_v0  ;;  %1442 = vmatprep.mubr.msk.bf16.mxu0 %vm1936_vm0, %v1935_v0  ;;  %v458_v3 = vld [vmem:[%s389_s20] sm:$0xf]  ;;  %v1633_v4 = vld [vmem:[#allocation11] sm:$0xff]   ;;  %vm475_vm1 = vcmask 261120   ;;  %v1634_v6 = vld [vmem:[#allocation11 + $0x8] sm:$0xff]   ;;  %vm520_vm2 = vcmask 257024  }
  0xd2   : > { %1446 = vmatprep.subr.bf16.mxu1 %v1935_v0  ;;  %1450 = vmatprep.mubr.msk.bf16.mxu1 %vm1936_vm0, %v1935_v0  ;;  %v1635_v5 = vld [vmem:[%s2427_s5] sm:$0xff]   ;;  %v1636_v8 = vld [vmem:[%s2427_s5 + $0x8] sm:$0xff]   ;;  %vm648_vm3 = vcmask 64512   ;;  %s1937_s21 = smov 112   ;;  %s1938_s1 = smov 120   ;;  %vm708_vm4 = vcmask 1043456  }
  0xd3   : > { %1439 = vmatpush3.bf16.msra.mxu0 %v1631_v1  ;;  %1447 = vmatpush3.bf16.msra.mxu1 %v1635_v5  ;;  %v584_v7 = vld [vmem:[%s380_s25] sm:$0xf]  ;;  %v522_v9 = vld [vmem:[%s398_s26] sm:$0xf]  ;;  %s1939_s9 = smov 104   ;;  %vm755_vm5 = vcmask 60416  }
  0xd4   : > { %1440 = vmatprep.subr.bf16.mxu0 %v1935_v0  ;;  %1448 = vmatprep.subr.bf16.mxu1 %v1935_v0  ;;  %s1940_s24 = smov 8   ;;  %s1941_s16 = smov 16   ;;  %vm881_vm6 = vcmask 126016   ;;  %vm1000_vm7 = vcmask 191616   ;;  %vm1119_vm8 = vcmask 257216  }
  0xd5   : > { %s2494_s12 = sld [smem:[#allocation23_spill]]  ;;  %s1942_s27 = smov 24  }
  0xd6   : > { %s1376_s19 = sshll.u32 %s2249_s3, 3  ;;  %s2495_s8 = sld [smem:[#allocation32_spill]] }
  0xd7   : > { %1441 = vmatpush3.bf16.msra.mxu0 %v1632_v2  ;;  %1449 = vmatpush3.bf16.msra.mxu1 %v1636_v8  ;;  %s2496_s23 = sld [smem:[#allocation28_spill]]  ;;  %s452_s30 = scalar_lea.vmem [#allocation16], %s1376_s19 }
  0xd8   : > { %1454 = vmatprep.subr.bf16.mxu0 %v1935_v0  ;;  %1462 = vmatprep.subr.bf16.mxu1 %v1935_v0  ;;  %s1204_s25 = sshll.u32 %s452_s30, 4  ;;  %s2497_s20 = sld [smem:[#allocation33_spill]]  ;;  %s2374_s25 = int_to_ptr.vmem [resolvable:$true] %s1204_s25 }
  0xd9   : > { %s1190_s11 = scalar_lea.sflag [#allocation7], %s2249_s3  ;;  %s1831_s13 = scalar_lea.vmem %s2374_s25, 128 }
  0xda   : > { %1443 = vmatmul.mubr.msk.bf16.vlgmr.msra.gmra.mrb[0].mxu0 %vm475_vm1, %v458_v3  ;;  %1451 = vmatmul.mubr.msk.bf16.vlgmr.msra.gmra.mrb[0].mxu1 %vm475_vm1, %v522_v9  ;;  %p1832_p4 = scmp.ne.s32.totalorder %s2374_s25, %s1831_s13  ;;  %s1943_s18 = smov [#allocation16]  }
  0xdb   : > { %1455 = vmatpush3.bf16.msra.mxu0 %v1633_v4  ;;  %1458 = vmatprep.mubr.msk.bf16.mxu0 %vm1936_vm0, %v1935_v0  ;;  %s1404_s7 = sshll.u32 %s2494_s12, 7  ;;  %s1835_s10 = sshll.u32 %s1943_s18, 4  ;;  %s1836_s10 = int_to_ptr.vmem [resolvable:$false] %s1835_s10 }
  0xdc   : > { %1456 = vmatprep.subr.bf16.mxu0 %v1935_v0  ;;  %1464 = vmatprep.mubr.msk.bf16.mxu1 %vm1936_vm0, %v1935_v0  ;;  %p1838_p13 = scmp.lt.s32.totalorder %s2374_s25, %s1836_s10 }
  0xdd   : > { %p2498_p7 = scmp.ne.s32.totalorder %s2496_s23, 0 }
  0xde   : > { %s2372_s26 = scalar_lea.hbm %s2497_s20, %s1404_s7 }
  0xdf   : > { %1457 = vmatpush3.bf16.msra.mxu0 %v1634_v6  ;;  %p1833_p3 = pnand %p1832_p4, %p2498_p7 }
  0xe0   : > { %1468 = vmatprep.subr.bf16.mxu0 %v1935_v0 }
  0xe1   : > { %p1834_p1 = pneg %p1833_p3 }
  0xe2   : > { %1459 = vmatmul.mubr.msk.bf16.vlgmr.msra.gmra.mrb[4].mxu0 %vm475_vm1, %v584_v7 }
  0xe3   : > { %1470 = vmatprep.mubr.msk.bf16.mxu0 %vm1936_vm0, %v1935_v0 }
 0x1ad   : > { %v513_v10 = vpop.f32.mrb[0].mxu0  ;;  %v576_v23 = vpop.f32.mrb[0].mxu1 }
 0x1ae   : > { %v519_v11 = vpack.c.bf16 %v513_v10, %v513_v10  ;;  %v1444_v12 = vpop.f32.mrb[1].mxu0  ;;  %v582_v24 = vpack.c.bf16 %v576_v23, %v576_v23  ;;  %v1452_v25 = vpop.f32.mrb[1].mxu1 }
 0x1af   : > { %v516_v13 = vpop.f32.mrb[2].mxu0  ;;  %v579_v26 = vpop.f32.mrb[2].mxu1 }
 0x1b0   : > { %521 = vst.msk [vmem:[#allocation2] sm:$0xf] %vm520_vm2, %v519_v11  ;;  %v1445_v14 = vpop.f32.mrb[3].mxu0  ;;  %583 = vst.msk [vmem:[#allocation3] sm:$0xf] %vm520_vm2, %v582_v24  ;;  %v1453_v27 = vpop.f32.mrb[3].mxu1 }
 0x1b5   : > { %v639_v15 = vpop.f32.mrb[4].mxu0 }
 0x1b6   : > { %v1460_v16 = vpop.f32.mrb[5].mxu0  ;;  %v645_v22 = vpack.c.bf16 %v639_v15, %v639_v15 }
 0x1b7   : > { %v646_v17 = vld [vmem:[#allocation2] sm:$0xf]  ;;  %v642_v18 = vpop.f32.mrb[6].mxu0  ;;  %v647_v28 = vld [vmem:[#allocation3] sm:$0xf] }
 0x1b8   : > { %v653_v19 = vsel %vm648_vm3, %v646_v17, 0  ;;  %v1388_v20 = vcombine.low %v646_v17, %v646_v17  ;;  %v1461_v21 = vpop.f32.mrb[7].mxu0  ;;  %v710_v29 = vsel %vm708_vm4, %v647_v28, 0  ;;  %v1390_v57 = vcombine.low %v647_v28, %v647_v28 }
 0x1b9   : > { %1463 = vmatpush3.bf16.xpose.msra.mxu1 %v653_v19  ;;  %1469 = vmatpush3.bf16.msra.mxu0 %v710_v29 }
 0x1ba   : > { %885 = vrot.lane.b32.xlu1 %v1388_v20, %s1937_s21  ;;  %763 = vrot.lane.b32.xlu0 %v1388_v20, %s1938_s1 }
 0x1bb   : > { %1474 = vmatprep.subr.bf16.mxu1 %v1935_v0  ;;  %1480 = vmatprep.subr.bf16.mxu0 %v1935_v0 }
 0x1be   : > { %883 = vrot.lane.b32.xlu1 %v645_v22, %s1937_s21  ;;  %758 = vrot.lane.b32.xlu0 %v645_v22, %s1938_s1 }
 0x1c0   : > { %1465 = vmatmul.mubr.msk.bf16.vlgmr.msra.gmra.mrb[4].mxu1 %vm648_vm3, %v645_v22 }
 0x1c1   : > { %1476 = vmatprep.mubr.msk.bf16.mxu1 %vm1936_vm0, %v1935_v0 }
 0x1c2   : > { %1002 = vrot.lane.b32.xlu1 %v645_v22, %s1939_s9  ;;  %1004 = vrot.lane.b32.xlu0 %v1388_v20, %s1939_s9 }
 0x22c   : > { %v764_v30 = vpop.permute.xlu0 %763  ;;  %v886_v32 = vpop.permute.xlu1 %885 }
 0x22d   : > { %v769_v31 = vsel %vm648_vm3, %v764_v30, 0  ;;  %v891_v34 = vsel %vm648_vm3, %v886_v32, 0 }
 0x22e   : > { %1475 = vmatpush3.bf16.xpose.msra.mxu1 %v769_v31 }
 0x22f   : > { %1486 = vmatprep.subr.bf16.mxu1 %v1935_v0 }
 0x230   : > { %v759_v33 = vpop.permute.xlu0 %758  ;;  %v884_v36 = vpop.permute.xlu1 %883 }
 0x234   : > { %v1005_v35 = vpop.permute.xlu0 %1004  ;;  %v1003_v38 = vpop.permute.xlu1 %1002 }
 0x235   : > { %1477 = vmatmul.mubr.msk.bf16.vlgmr.msra.gmra.mrb[8].mxu1 %vm648_vm3, %v759_v33  ;;  %v1010_v37 = vsel %vm648_vm3, %v1005_v35, 0 }
 0x236   : > { %1487 = vmatpush3.bf16.xpose.msra.mxu1 %v891_v34  ;;  %1488 = vmatprep.mubr.msk.bf16.mxu1 %vm1936_vm0, %v1935_v0 }
 0x237   : > { %1498 = vmatprep.subr.bf16.mxu1 %v1935_v0 }
 0x23d   : > { %1489 = vmatmul.mubr.msk.bf16.vlgmr.msra.gmra.mrb[12].mxu1 %vm648_vm3, %v884_v36 }
 0x23e   : > { %1499 = vmatpush3.bf16.xpose.msra.mxu1 %v1010_v37  ;;  %1500 = vmatprep.mubr.msk.bf16.mxu1 %vm1936_vm0, %v1935_v0 }
 0x23f   : > { %1510 = vmatprep.subr.bf16.mxu1 %v1935_v0 }
 0x245   : > { %1501 = vmatmul.mubr.msk.bf16.vlgmr.msra.gmra.mrb[16].mxu1 %vm648_vm3, %v1003_v38 }
 0x246   : > { %1514 = vmatprep.mubr.msk.bf16.mxu1 %vm1936_vm0, %v1935_v0 }
 0x293   : > { %v689_v39 = vpop.f32.mrb[4].mxu1 }
 0x294   : > { %v1466_v40 = vpop.f32.mrb[5].mxu1  ;;  %v695_v41 = vsel %vm648_vm3, %v689_v39, -inf }
 0x295   : > { %696 = vmax.xlane.f32.xlu0 %v695_v41  ;;  %v692_v42 = vpop.f32.mrb[6].mxu1 }
 0x296   : > { %v1467_v43 = vpop.f32.mrb[7].mxu1 }
 0x308   : > { %v805_v44 = vpop.f32.mrb[8].mxu1 }
 0x309   : > { %v1478_v45 = vpop.f32.mrb[9].mxu1  ;;  %v811_v46 = vsel %vm648_vm3, %v805_v44, -inf }
 0x30a   : > { %812 = vmax.xlane.f32.xlu1 %v811_v46  ;;  %v808_v47 = vpop.f32.mrb[10].mxu1 }
 0x30b   : > { %v1479_v48 = vpop.f32.mrb[11].mxu1  ;;  %v1639_v47 = vld [vmem:[#allocation14] sm:$0xff]  }
 0x30c   : > { %1511 = vmatpush3.bf16.msra.mxu1 %v1639_v47 }
 0x30d   : > { %1512 = vmatprep.subr.bf16.mxu1 %v1935_v0 }
 0x310   : > { %v927_v49 = vpop.f32.mrb[12].mxu1 }
 0x311   : > { %v1490_v50 = vpop.f32.mrb[13].mxu1  ;;  %v933_v51 = vsel %vm648_vm3, %v927_v49, -inf }
 0x312   : > { %934 = vmax.xlane.f32.xlu0 %v933_v51  ;;  %v930_v52 = vpop.f32.mrb[14].mxu1  ;;  %v1640_v51 = vld [vmem:[#allocation14 + $0x8] sm:$0xff]  }
 0x313   : > { %v1491_v53 = vpop.f32.mrb[15].mxu1  ;;  %1513 = vmatpush3.bf16.msra.mxu1 %v1640_v51 }
 0x318   : > { %v1046_v54 = vpop.f32.mrb[16].mxu1 }
 0x319   : > { %v1502_v55 = vpop.f32.mrb[17].mxu1  ;;  %v1052_v56 = vsel %vm648_vm3, %v1046_v54, -inf }
 0x31a   : > { %1053 = vmax.xlane.f32.xlu0 %v1052_v56  ;;  %v1049_v58 = vpop.f32.mrb[18].mxu1 }
 0x31b   : > { %824 = vrot.lane.b32.xlu1 %v1390_v57, %s1938_s1  ;;  %v1503_v59 = vpop.f32.mrb[19].mxu1 }
 0x31f   : > { %1062 = vrot.lane.b32.xlu1 %v1390_v57, %s1939_s9 }
 0x322   : > { %v697_v60 = vpop.xlane.xlu0 %696 }
 0x323   : > { %v698_v61 = vsub.f32 %v689_v39, %v697_v60 }
 0x325   : > { %v699_v62 = vmul.f32 1.442695, %v698_v61 }
 0x327   : > { %1641 = vpow2.f32 %v699_v62 }
 0x330   : > { %943 = vrot.lane.b32.xlu0 %v1390_v57, %s1937_s21  ;;  %s1837_s21 = scalar_lea.vmem %s1836_s10, 256 }
 0x331   : > { %v1642_v63 = vpop.eup %1641  ;;  %p1839_p6 = scmp.lt.s32.totalorder %s1837_s21, %s1831_s13 }
 0x332   : > { %v704_v1 = vpack.c.bf16 %v1642_v63, %v1642_v63  ;;  %v701_v17 = vsel %vm648_vm3, %v1642_v63, 0.0 }
 0x333   : > { %p1840_p0 = por %p1839_p6, %p1838_p13 }
 0x334   : > { %1471 = vmatmul.mubr.msk.bf16.vlgmr.msra.gmra.mrb[8].mxu0 %vm648_vm3, %v704_v1  ;;  %v1399_v1 = vld [vmem:[%s2495_s8] ss:$0 sm:$0xff] }
 0x335   : > { %1482 = vmatprep.mubr.msk.bf16.mxu0 %vm1936_vm0, %v1935_v0  ;;  %p1841_p12 = pnand %p1840_p0, %p1834_p1 }
 0x397   : > { %v813_v2 = vpop.xlane.xlu1 %812 }
 0x398   : > { %v814_v3 = vsub.f32 %v805_v44, %v813_v2 }
 0x39a   : > { %v815_v4 = vmul.f32 1.442695, %v814_v3 }
 0x39b   : > { %v825_v5 = vpop.permute.xlu1 %824 }
 0x39c   : > { %1643 = vpow2.f32 %v815_v4  ;;  %v830_v6 = vsel %vm708_vm4, %v825_v5, 0 }
 0x39d   : > { %1481 = vmatpush3.bf16.msra.mxu0 %v830_v6 }
 0x39e   : > { %1492 = vmatprep.subr.bf16.mxu0 %v1935_v0 }
 0x39f   : > { %v935_v7 = vpop.xlane.xlu0 %934  ;;  %v1063_v20 = vpop.permute.xlu1 %1062 }
 0x3a0   : > { %v936_v8 = vsub.f32 %v927_v49, %v935_v7  ;;  %v1068_v23 = vsel %vm708_vm4, %v1063_v20, 0 }
 0x3a2   : > { %v937_v9 = vmul.f32 1.442695, %v936_v8 }
 0x3a4   : > { %1645 = vpow2.f32 %v937_v9 }
 0x3a6   : > { %v1644_v10 = vpop.eup %1643 }
 0x3a7   : > { %v1054_v11 = vpop.xlane.xlu0 %1053  ;;  %v817_v12 = vsel %vm648_vm3, %v1644_v10, 0.0  ;;  %v820_v13 = vpack.c.bf16 %v1644_v10, %v1644_v10 }
 0x3a8   : > { %v1055_v14 = vsub.f32 %v1046_v54, %v1054_v11  ;;  %818 = vadd.xlane.f32.xlu1 %v817_v12 }
 0x3a9   : > { %1483 = vmatmul.mubr.msk.bf16.vlgmr.msra.gmra.mrb[12].mxu0 %vm648_vm3, %v820_v13 }
 0x3aa   : > { %v1056_v15 = vmul.f32 1.442695, %v1055_v14  ;;  %1494 = vmatprep.mubr.msk.bf16.mxu0 %vm1936_vm0, %v1935_v0 }
 0x3ab   : > { %v944_v16 = vpop.permute.xlu0 %943 }
 0x3ac   : > { %1647 = vpow2.f32 %v1056_v15  ;;  %v949_v18 = vsel %vm708_vm4, %v944_v16, 0  ;;  %702 = vadd.xlane.f32.xlu1 %v701_v17 }
 0x3ad   : > { %1493 = vmatpush3.bf16.msra.mxu0 %v949_v18 }
 0x3ae   : > { %v1646_v19 = vpop.eup %1645  ;;  %1504 = vmatprep.subr.bf16.mxu0 %v1935_v0 }
 0x3af   : > { %v939_v21 = vsel %vm648_vm3, %v1646_v19, 0.0  ;;  %v942_v22 = vpack.c.bf16 %v1646_v19, %v1646_v19 }
 0x3b0   : > { %940 = vadd.xlane.f32.xlu0 %v939_v21 }
 0x3b1   : > { %1495 = vmatmul.mubr.msk.bf16.vlgmr.msra.gmra.mrb[16].mxu0 %vm648_vm3, %v942_v22 }
 0x3b2   : > { %1505 = vmatpush3.bf16.msra.mxu0 %v1068_v23  ;;  %1506 = vmatprep.mubr.msk.bf16.mxu0 %vm1936_vm0, %v1935_v0 }
 0x3b6   : > { %v1648_v24 = vpop.eup %1647 }
 0x3b7   : > { %v1058_v25 = vsel %vm648_vm3, %v1648_v24, 0.0  ;;  %v1061_v26 = vpack.c.bf16 %v1648_v24, %v1648_v24 }
 0x3b8   : > { %1059 = vadd.xlane.f32.xlu0 %v1058_v25 }
 0x3b9   : > { %1507 = vmatmul.mubr.msk.bf16.vlgmr.msra.gmra.mrb[20].mxu0 %vm648_vm3, %v1061_v26 }
 0x407   : > { %v746_v27 = vpop.f32.mrb[8].mxu0 }
 0x408   : > { %v1472_v28 = vpop.f32.mrb[9].mxu0 }
 0x409   : > { %v749_v29 = vpop.f32.mrb[10].mxu0 }
 0x40a   : > { %v1473_v30 = vpop.f32.mrb[11].mxu0 }
 0x435   : > { %v819_v31 = vpop.xlane.xlu1 %818 }
 0x439   : > { %v703_v32 = vpop.xlane.xlu1 %702 }
 0x43a   : > { %1649 = vrcp.f32 %v703_v32 }
 0x43b   : > { %1651 = vrcp.f32 %v819_v31 }
 0x43d   : > { %v941_v36 = vpop.xlane.xlu0 %940 }
 0x43e   : > { %1653 = vrcp.f32 %v941_v36 }
 0x444   : > { %v1650_v33 = vpop.eup %1649 }
 0x445   : > { %v753_v34 = vmul.f32 %v1650_v33, %v746_v27  ;;  %v1652_v37 = vpop.eup %1651  ;;  %v1060_v42 = vpop.xlane.xlu0 %1059 }
 0x446   : > { %1655 = vrcp.f32 %v1060_v42 }
 0x447   : > { %v754_v35 = vpack.c.bf16 %v753_v34, %v753_v34 }
 0x448   : > { %v1654_v45 = vpop.eup %1653 }
 0x449   : > { %756 = vst.msk [vmem:[#allocation4] sm:$0xf] %vm755_vm5, %v754_v35 }
 0x450   : > { %v1656_v54 = vpop.eup %1655 }
 0x47c   : > { %v866_v38 = vpop.f32.mrb[12].mxu0 }
 0x47d   : > { %v873_v39 = vmul.f32 %v1652_v37, %v866_v38  ;;  %v1484_v40 = vpop.f32.mrb[13].mxu0 }
 0x47e   : > { %v869_v41 = vpop.f32.mrb[14].mxu0 }
 0x47f   : > { %v1407_v43 = vpack.c.bf16 %v873_v39, %v873_v39  ;;  %v1485_v44 = vpop.f32.mrb[15].mxu0 }
 0x481   : > { %878 = vrot.lane.b32.xlu0 %v1407_v43, %s1940_s24 }
 0x484   : > { %v985_v46 = vpop.f32.mrb[16].mxu0 }
 0x485   : > { %v992_v48 = vmul.f32 %v1654_v45, %v985_v46  ;;  %v1496_v49 = vpop.f32.mrb[17].mxu0 }
 0x486   : > { %v988_v50 = vpop.f32.mrb[18].mxu0 }
 0x487   : > { %v1408_v52 = vpack.c.bf16 %v992_v48, %v992_v48  ;;  %v1497_v53 = vpop.f32.mrb[19].mxu0 }
 0x489   : > { %997 = vrot.lane.b32.xlu1 %v1408_v52, %s1941_s16 }
 0x48c   : > { %v1104_v55 = vpop.f32.mrb[20].mxu0 }
 0x48d   : > { %v1111_v56 = vmul.f32 %v1656_v54, %v1104_v55  ;;  %v1508_v57 = vpop.f32.mrb[21].mxu0 }
 0x48e   : > { %v1107_v58 = vpop.f32.mrb[22].mxu0 }
 0x48f   : > { %v1409_v59 = vpack.c.bf16 %v1111_v56, %v1111_v56  ;;  %v1509_v60 = vpop.f32.mrb[23].mxu0 }
 0x491   : > { %1116 = vrot.lane.b32.xlu1 %v1409_v59, %s1942_s27 }
 0x4f3   : > { %v879_v61 = vpop.permute.xlu0 %878 }
 0x4f4   : > { %882 = vst.msk [vmem:[#allocation4] sm:$0xf] %vm881_vm6, %v879_v61 }
 0x4fb   : > { %v998_v62 = vpop.permute.xlu1 %997 }
 0x4fc   : > { %1001 = vst.msk [vmem:[#allocation4] sm:$0xf] %vm1000_vm7, %v998_v62 }
 0x503   : > { %v1117_v0 = vpop.permute.xlu1 %1116 }
 0x504   : > { %1120 = vst.msk [vmem:[#allocation4] sm:$0xf] %vm1119_vm8, %v1117_v0 }
 0x50b   : > { %v1121_v63 = vld [vmem:[#allocation4] sm:$0xf] }
 0x50c   : > { %1515 = vmatmul.mubr.msk.bf16.vlgmr.msra.gmra.mrb[20].mxu1 %vm475_vm1, %v1121_v63 }
 0x5df   : > { %v1182_v2 = vpop.f32.mrb[20].mxu1 }
 0x5e0   : > { %v1183_v3 = vadd.f32 %v1399_v1, %v1182_v2  ;;  %v1516_v4 = vpop.f32.mrb[21].mxu1 }
 0x5e1   : > { %v1185_v5 = vpop.f32.mrb[22].mxu1 }
 0x5e2   : > { %v1517_v6 = vpop.f32.mrb[23].mxu1  ;;  %1188 = vst.msk [vmem:[%s452_s30] sm:$0xff] %vm475_vm1, %v1183_v3 }
 0x5e3   : > { %1844 = shalt.err (!%p1841_p12)
}
 0x5e4   : > { %s1845_s3 = scalar_lea.hbm %s2372_s26, 128  ;;  %s1849_s24 = scalar_lea.hbm %s2497_s20, 256 }
 0x5e5   : > { %p1846_p8 = scmp.ne.s32.totalorder %s2372_s26, %s1845_s3  ;;  %p1850_p5 = scmp.lt.u32.totalorder %s2372_s26, %s2497_s20 }
 0x5e6   : > { %p1851_p9 = scmp.lt.u32.totalorder %s1849_s24, %s1845_s3  ;;  %p1853_p4 = scmp.lt.u32.totalorder %s1845_s3, %s2372_s26 }
 0x5e7   : > { %p1847_p11 = pnand %p1846_p8, %p2498_p7 }
 0x5e8   : > { %p1852_p2 = por %p1851_p9, %p1850_p5 }
 0x5e9   : > { %p1848_p10 = pneg %p1847_p11 }
 0x5ea   : > { %p1854_p3 = por %p1853_p4, %p1852_p2 }
 0x5ec   : > { %p1855_p1 = pnand %p1854_p3, %p1848_p10 }
 0x5ee   : > { %1858 = shalt.err (!%p1855_p1)
}
 0x5ef   : > { %1536 = dma.vmem_to_hbm [thread:$0]  (%p2498_p7), %s2374_s25, 128, %s2372_s26, %s1190_s11  }
 0x5f0 PF: > { %s2499_s27 = sld [smem:[#allocation22_spill]]  ;;  %s2500_s19 = sld [smem:[#allocation26_spill]] }
 0x5f1   : > { %s2501_s17 = sld [smem:[#allocation25_spill]] }
 0x5f6   : > { %s1216_s22 = sand.u32 1, %s2499_s27   ;;  %p2502_p13 = scmp.ne.s32.totalorder %s2500_s19, 0 }
 0x5f7   : > { %p2503_p6 = scmp.ge.s32.totalorder %s2501_s17, 2  ;;  %s1217_s8 = scalar_lea.sflag [#allocation7], %s1216_s22 }
 0x5f9   : > { %p1559_p0 = pnand %p2503_p6, %p2502_p13 }
 0x5fb   : > { %1900 = dma.done.wait (!%p1559_p0), %s1217_s8, 128  }
 0x5fc   : > { %1902 = vsyncadd (!%p1559_p0), %s1217_s8, 4294967168  ;;  %s29_s10 = sadd.s32 1, %s2501_s17   ;;  %s2504_s23 = sld [smem:[#allocation29_spill]] }
 0x5fd   : > { %p26_p12 = scmp.ge.s32.totalorder %s29_s10, 4   ;;  %s2505_s30 = sld [smem:[#allocation24_spill]] }
 0x5fe   : > { %s2506_s9 = sld [smem:[#allocation27_spill]]  ;;  %s2507_s27 = smov %s1909_s28 }
 0x5ff   : > { %s2508_s28 = smov %s1913_s29  ;;  %28 = sbr.rel (!%p26_p12) target bundleno = 15 (0xf), region = 137 }
 0x602   : > { %s2509_s29 = smov %s2504_s23 }
 0x606   :  { %1222 = vsyncpa [#allocation6], 1 }
 0x607   :  { %1224 = vsyncpa [#allocation6 + $0x1], 1 }
 0x608   :  { %1225 = vsyncpa [#allocation9], 1 }
 0x609   :  { %1227 = vsyncpa [#allocation9 + $0x1], 1 }
 0x60a   :  { %1228 = vsyncpa [#allocation12], 1 }
 0x60b   :  { %1229 = vsyncpa [#allocation15], 1 }
 0x60c   :  { %1230 = vsyncpa [#allocation7], 1 }
 0x60d   :  { %1232 = vsyncpa [#allocation7 + $0x1], 1 }

// kernel: tpu_custom_call.1
= control target key start
LH: loop header
LB: loop body
LE: loop exit
PB: predicated region body
PF: predicated region fallthrough
CT: control target
= control target key end

     0   :  { %s2422_s0 = inlined_call_operand.hbm [shape: bf16[2,8,32], index: 0, kind: input, shape index: {}]   ;;  %s2423_s1 = inlined_call_operand.hbm [shape: bf16[2,8,32], index: 1, kind: input, shape index: {}]   ;;  %s2424_s2 = inlined_call_operand.hbm [shape: bf16[2,8,32], index: 2, kind: input, shape index: {}]   ;;  %s2425_s3 = inlined_call_operand.hbm [shape: bf16[32,32], index: 3, kind: input, shape index: {}]   ;;  %s2426_s4 = inlined_call_operand.hbm [shape: bf16[32,32], index: 4, kind: input, shape index: {}]   ;;  %s2427_s5 = inlined_call_operand.vmem [shape: bf16[32,32], index: 5, kind: input, shape index: {}]   ;;  %s2428_s6 = inlined_call_operand.hbm [shape: bf16[32,32], index: 6, kind: input, shape index: {}]   ;;  %s2429_s7 = inlined_call_operand.vmem [shape: f32[1,32], index: 7, kind: input, shape index: {}]   ;;  %s2430_s8 = inlined_call_operand.hbm [shape: f32[2,8,32], index: 8, kind: output, shape index: {}]  }
   0x1   :  { %2457 = sst [smem:[#allocation30_spill]] %s2423_s1 }
   0x2   :  { %2458 = sst [smem:[#allocation31_spill]] %s2425_s3 }
   0x3   :  { %2459 = sst [smem:[#allocation32_spill]] %s2429_s7 }
   0x4   :  { %2460 = sst [smem:[#allocation33_spill]] %s2430_s8 }
   0x5   :  { %13 = vsyncpa [#allocation6], 0 }
   0x6   :  { %15 = vsyncpa [#allocation6 + $0x1], 0 }
   0x7   :  { %16 = vsyncpa [#allocation9], 0 }
   0x8   :  { %18 = vsyncpa [#allocation9 + $0x1], 0 }
   0x9   :  { %19 = vsyncpa [#allocation12], 0 }
   0xa   :  { %20 = vsyncpa [#allocation15], 0 }
   0xb   :  { %21 = vsyncpa [#allocation7], 0 }
   0xc   :  { %23 = vsyncpa [#allocation7 + $0x1], 0  ;;  %s1989_s27 = smov 0   ;;  %s1991_s28 = smov 0  }
   0xd   :  { %s1993_s29 = smov 0   ;;  %s1995_s30 = smov 0  }
   0xe   :  { %s1997_s9 = smov 0   ;;  %s1999_s10 = smov 0  }
   0xf LB: > { %2461 = sst [smem:[#allocation22_spill]] %s1905_s27  ;;  %s2020_s11 = sadd.s32 4294967295, %s1925_s10   ;;  %s1925_s10 = sphi %s1999_s10, %s29_s10   ;;  %s1921_s9 = sphi %s1997_s9, %s2506_s9   ;;  %s1917_s30 = sphi %s1995_s30, %s2505_s30   ;;  %s1913_s29 = sphi %s1993_s29, %s2509_s29   ;;  %s1909_s28 = sphi %s1991_s28, %s2508_s28   ;;  %s1905_s27 = sphi %s1989_s27, %s2507_s27  }
  0x10   : > { %2462 = sst [smem:[#allocation23_spill]] %s1917_s30  ;;  %s1357_s12 = sadd.s32 4294967294, %s1925_s10  }
  0x11   : > { %2463 = sst [smem:[#allocation24_spill]] %s1921_s9  ;;  %p63_p0 = scmp.ne.s32.totalorder %s1909_s28, %s1905_s27 }
  0x12   : > { %2464 = sst [smem:[#allocation25_spill]] %s1925_s10  ;;  %p2431_p1 = scmp.eq.s32.totalorder %s2020_s11, 0 }
  0x13   : > { %p252_p3 = scmp.eq.s32.totalorder %s1357_s12, 1  ;;  %p1358_p5 = scmp.ge.s32.totalorder %s1925_s10, 1 }
  0x14   : > { %p2029_p4 = por %p2431_p1, %p63_p0  ;;  %p259_p7 = scmp.lt.s32.totalorder %s1925_s10, 3 }
  0x15   : > { %p2034_p6 = por %p252_p3, %p63_p0  ;;  %s1927_s16 = smov [#allocation11]  }
  0x16   : > { %s2465_s13 = scalar_select %p2029_p4, 1, 0 }
  0x17   : > { %s2466_s14 = scalar_select %p2034_p6, 1, 0 }
  0x18   : > { %p2039_p8 = pnand %p1358_p5, %p259_p7  ;;  %s271_s17 = sshll.u32 %s1927_s16, 4  ;;  %s272_s17 = int_to_ptr.vmem [resolvable:$true] %s271_s17 }
  0x19   : > { %2467 = sst [smem:[#allocation26_spill]] %s2466_s14  ;;  %s41_s19 = sadd.s32 1, %s1921_s9 }
  0x1a   : > { %s2468_s15 = scalar_select %p2039_p8, 1, 0 }
  0x1b   : > { %p1538_p9 = pneg %p2039_p8  ;;  %s2470_s3 = sld [smem:[#allocation31_spill]] }
  0x1d   : > { %p2048_p11 = pnand %p1538_p9, %p2431_p1 }
  0x1f   : > { %s2469_s18 = scalar_select %p2048_p11, 1, 0 }
  0x20   : > { %p2061_p13 = pneg %p2048_p11 }
  0x21   : > { %s1657_s22 = scalar_lea.hbm %s2470_s3, 256 }
  0x22   : > { %p1658_p12 = scmp.ne.s32.totalorder %s2470_s3, %s1657_s22  ;;  %p1664_p5 = scmp.lt.u32.totalorder %s1657_s22, %s2470_s3 }
  0x23   : > { %s2471_s25 = scalar_select %p2061_p13, 1, 0 }
  0x24   : > { %p1660_p0 = pnand %p2061_p13, %p1658_p12 }
  0x26   : > { %p1661_p3 = pneg %p1660_p0 }
  0x28   : > { %p1666_p7 = pnand %p1664_p5, %p1661_p3 }
  0x2a   : > { %1669 = shalt.err (!%p1666_p7)
}
  0x2b   : > { %s1670_s16 = scalar_lea.vmem %s272_s17, 256  ;;  %p1678_p2 = scmp.lt.s32.totalorder %s272_s17, %s272_s17 }
  0x2c   : > { %p1671_p9 = scmp.ne.s32.totalorder %s272_s17, %s1670_s16  ;;  %p1679_p6 = scmp.lt.s32.totalorder %s1670_s16, %s1670_s16 }
  0x2e   : > { %p1673_p10 = pnand %p1671_p9, %p2061_p13  ;;  %p1680_p4 = por %p1679_p6, %p1678_p2 }
  0x30   : > { %p1674_p1 = pneg %p1673_p10 }
  0x32   : > { %p1681_p8 = pnand %p1680_p4, %p1674_p1 }
  0x34   : > { %1684 = shalt.err (!%p1681_p8)
}
  0x35   : > { %s2434_s20 = smov 64   ;;  %s2436_s21 = smov 4  }
  0x36   : > { %1541 = dma.hbm_to_vmem [thread:$0]  (!%p2048_p11), %s2470_s3, 256, %s272_s17, [#allocation12], %s2434_s20, %s2434_s20, %s2436_s21  }
  0x37   : > { %p43_p1 = scmp.ge.s32.totalorder %s41_s19, 2  ;;  %s50_s24 = sadd.s32 1, %s1913_s29 }
  0x38   : > { %p57_p2 = scmp.ne.s32.totalorder %s1913_s29, %s1909_s28  ;;  %p58_p4 = scmp.eq.s32.totalorder %s1925_s10, 0 }
  0x39   : > { %s2511_s19 = smov (%p43_p1, %s41_s19), 0  ;;  %p2473_p8 = scmp.eq.s32.totalorder %s2020_s11, 1 }
  0x3a   : > { %2472 = sst [smem:[#allocation27_spill]] %s2511_s19  ;;  %p59_p6 = por %p58_p4, %p57_p2 }
  0x3b   : > { %p2088_p10 = por %p2473_p8, %p57_p2  ;;  %s45_s12 = ssub.s32 %s1921_s9, %s2511_s19 }
  0x3c   : > { %p1565_p12 = scmp.lt.s32.totalorder %s1925_s10, 2  ;;  %p48_p0 = scmp.eq.s32.totalorder %s45_s12, 0 }
  0x3d   : > { %s2474_s26 = scalar_select %p2088_p10, 1, 0 }
  0x3e   : > { %s2439_s16 = sand.u32 1, %s1913_s29   ;;  %s2101_s22 = sshll.u32 %s1921_s9, 6 }
  0x3f   : > { %2475 = sst [smem:[#allocation28_spill]] %s2474_s26  ;;  %s2098_s17 = sshll.u32 %s2439_s16, 2 }
  0x40   : > { %s2104_s23 = scalar_select %p48_p0, %s1913_s29, %s50_s24  }
  0x41   : > { %p2106_p3 = pnand %p1565_p12, %p59_p6  ;;  %s336_s21 = sand.u32 1, %s1925_s10  }
  0x42   : > { %2476 = sst [smem:[#allocation29_spill]] %s2104_s23  ;;  %s2478_s1 = sld [smem:[#allocation30_spill]] }
  0x43   : > { %s2477_s20 = scalar_select %p2106_p3, 1, 0 }
  0x44   : > { %s340_s16 = scalar_lea.vmem [#allocation8], %s2098_s17  ;;  %s1930_s24 = smov [#allocation13]  }
  0x45   : > { %s347_s9 = sshll.u32 %s340_s16, 4  ;;  %s2120_s23 = sshll.u32 %s1930_s24, 4  ;;  %s2118_s9 = int_to_ptr.vmem [resolvable:$true] %s347_s9  ;;  %s285_s23 = int_to_ptr.vmem [resolvable:$true] %s2120_s23 }
  0x46   : > { %s2122_s14 = scalar_lea.sflag [#allocation9], %s336_s21  ;;  %p2128_p7 = pneg %p2106_p3 }
  0x48   : > { %s2115_s12 = scalar_lea.hbm %s2478_s1, %s2101_s22  ;;  %s1690_s10 = scalar_lea.hbm %s2478_s1, 128 }
  0x49   : > { %s1685_s27 = scalar_lea.hbm %s2115_s12, 64  ;;  %p1691_p2 = scmp.lt.u32.totalorder %s2115_s12, %s2478_s1 }
  0x4a   : > { %p1686_p5 = scmp.ne.s32.totalorder %s2115_s12, %s1685_s27  ;;  %p1692_p4 = scmp.lt.u32.totalorder %s1690_s10, %s1685_s27 }
  0x4b   : > { %s2479_s3 = scalar_select %p2128_p7, 1, 0 }
  0x4c   : > { %p1688_p9 = pnand %p2128_p7, %p1686_p5  ;;  %p1693_p6 = por %p1692_p4, %p1691_p2 }
  0x4d   : > { %p1694_p8 = scmp.lt.u32.totalorder %s1685_s27, %s2115_s12 }
  0x4e   : > { %p1689_p1 = pneg %p1688_p9 }
  0x4f   : > { %p1695_p12 = por %p1694_p8, %p1693_p6 }
  0x51   : > { %p1696_p0 = pnand %p1695_p12, %p1689_p1 }
  0x53   : > { %1699 = shalt.err (!%p1696_p0)
}
  0x54   : > { %s1700_s21 = scalar_lea.vmem %s2118_s9, 64  ;;  %s1931_s19 = smov [#allocation8]  }
  0x55   : > { %p1701_p5 = scmp.ne.s32.totalorder %s2118_s9, %s1700_s21  ;;  %s1705_s16 = sshll.u32 %s1931_s19, 4  ;;  %s1706_s16 = int_to_ptr.vmem [resolvable:$false] %s1705_s16 }
  0x56   : > { %s1707_s8 = scalar_lea.vmem %s1706_s16, 128  ;;  %p1708_p11 = scmp.lt.s32.totalorder %s2118_s9, %s1706_s16 }
  0x57   : > { %p1703_p9 = pnand %p1701_p5, %p2128_p7  ;;  %p1709_p13 = scmp.lt.s32.totalorder %s1707_s8, %s1700_s21 }
  0x59   : > { %p1704_p10 = pneg %p1703_p9  ;;  %p1710_p2 = por %p1709_p13, %p1708_p11 }
  0x5b   : > { %p1711_p4 = pnand %p1710_p2, %p1704_p10 }
  0x5d   : > { %1714 = shalt.err (!%p1711_p4)
}
  0x5e   : > { %1554 = dma.hbm_to_vmem [thread:$0]  (!%p2106_p3), %s2115_s12, 64, %s2118_s9, %s2122_s14  }
  0x5f   : > { %s1715_s24 = scalar_lea.hbm %s2426_s4, 256  ;;  %p2480_p11 = scmp.ne.s32.totalorder %s2471_s25, 0 }
  0x60   : > { %p1716_p1 = scmp.ne.s32.totalorder %s2426_s4, %s1715_s24  ;;  %p1722_p6 = scmp.lt.u32.totalorder %s1715_s24, %s2426_s4 }
  0x62   : > { %p1718_p13 = pnand %p1716_p1, %p2480_p11 }
  0x64   : > { %p1719_p10 = pneg %p1718_p13 }
  0x66   : > { %p1724_p8 = pnand %p1722_p6, %p1719_p10 }
  0x68   : > { %1727 = shalt.err (!%p1724_p8)
}
  0x69   : > { %s1728_s8 = scalar_lea.vmem %s285_s23, 256  ;;  %p1736_p9 = scmp.lt.s32.totalorder %s285_s23, %s285_s23 }
  0x6a   : > { %p1729_p12 = scmp.ne.s32.totalorder %s285_s23, %s1728_s8  ;;  %p1737_p2 = scmp.lt.s32.totalorder %s1728_s8, %s1728_s8 }
  0x6c   : > { %p1731_p0 = pnand %p1729_p12, %p2480_p11  ;;  %p1738_p4 = por %p1737_p2, %p1736_p9 }
  0x6e   : > { %p1732_p5 = pneg %p1731_p0 }
  0x70   : > { %p1739_p3 = pnand %p1738_p4, %p1732_p5 }
  0x72   : > { %1742 = shalt.err (!%p1739_p3)
}
  0x73   : > { %p2481_p1 = scmp.ne.s32.totalorder %s2469_s18, 0  ;;  %s2482_s1 = smov 4  }
  0x74   : > { %s2483_s9 = smov 64   ;;  %s1932_s10 = smov [#allocation14]  }
  0x75   : > { %1544 = dma.hbm_to_vmem [thread:$0]  (!%p2481_p1), %s2426_s4, 256, %s285_s23, [#allocation12], %s2483_s9, %s2483_s9, %s2482_s1  }
  0x76   : > { %s300_s24 = sshll.u32 %s1932_s10, 4  ;;  %s1743_s16 = scalar_lea.hbm %s2428_s6, 256  ;;  %s301_s24 = int_to_ptr.vmem [resolvable:$true] %s300_s24 }
  0x77   : > { %p1744_p3 = scmp.ne.s32.totalorder %s2428_s6, %s1743_s16  ;;  %p1750_p6 = scmp.lt.u32.totalorder %s1743_s16, %s2428_s6 }
  0x79   : > { %p1746_p13 = pnand %p1744_p3, %p2480_p11 }
  0x7b   : > { %p1747_p10 = pneg %p1746_p13 }
  0x7d   : > { %p1752_p8 = pnand %p1750_p6, %p1747_p10 }
  0x7f   : > { %1755 = shalt.err (!%p1752_p8)
}
  0x80   : > { %s1756_s23 = scalar_lea.vmem %s301_s24, 256  ;;  %p1764_p9 = scmp.lt.s32.totalorder %s301_s24, %s301_s24 }
  0x81   : > { %p1757_p12 = scmp.ne.s32.totalorder %s301_s24, %s1756_s23  ;;  %p1765_p2 = scmp.lt.s32.totalorder %s1756_s23, %s1756_s23 }
  0x83   : > { %p1759_p0 = pnand %p1757_p12, %p2480_p11  ;;  %p1766_p4 = por %p1765_p2, %p1764_p9 }
  0x85   : > { %p1760_p5 = pneg %p1759_p0 }
  0x87   : > { %p1767_p7 = pnand %p1766_p4, %p1760_p5 }
  0x89   : > { %1770 = shalt.err (!%p1767_p7)
}
  0x8a   : > { %1547 = dma.hbm_to_vmem [thread:$0]  (!%p2481_p1), %s2428_s6, 256, %s301_s24, [#allocation15], %s2483_s9, %s2483_s9, %s2482_s1  }
  0x8b   : > { %s2199_s12 = scalar_lea.hbm %s2422_s0, %s2101_s22  ;;  %s321_s18 = scalar_lea.vmem [#allocation5], %s2098_s17 }
  0x8c   : > { %s329_s27 = sshll.u32 %s321_s18, 4  ;;  %s2484_s10 = sand.u32 1, %s1913_s29   ;;  %s330_s27 = int_to_ptr.vmem [resolvable:$true] %s329_s27 }
  0x8d   : > { %s318_s19 = scalar_lea.sflag [#allocation6], %s2484_s10  ;;  %s1771_s21 = scalar_lea.hbm %s2199_s12, 64 }
  0x8e   : > { %p1772_p7 = scmp.ne.s32.totalorder %s2199_s12, %s1771_s21  ;;  %p2485_p11 = scmp.ne.s32.totalorder %s2479_s3, 0 }
  0x8f   : > { %s1776_s24 = scalar_lea.hbm %s2422_s0, 128  ;;  %p1777_p1 = scmp.lt.u32.totalorder %s2199_s12, %s2422_s0 }
  0x90   : > { %p1774_p3 = pnand %p1772_p7, %p2485_p11  ;;  %p1778_p10 = scmp.lt.u32.totalorder %s1776_s24, %s1771_s21 }
  0x91   : > { %p1780_p8 = scmp.lt.u32.totalorder %s1771_s21, %s2199_s12 }
  0x92   : > { %p1775_p13 = pneg %p1774_p3  ;;  %p1779_p6 = por %p1778_p10, %p1777_p1 }
  0x94   : > { %p1781_p12 = por %p1780_p8, %p1779_p6 }
  0x96   : > { %p1782_p0 = pnand %p1781_p12, %p1775_p13 }
  0x98   : > { %1785 = shalt.err (!%p1782_p0)
}
  0x99   : > { %s1786_s23 = scalar_lea.vmem %s330_s27, 64  ;;  %s1933_s7 = smov [#allocation5]  }
  0x9a   : > { %p1787_p5 = scmp.ne.s32.totalorder %s330_s27, %s1786_s23  ;;  %s1791_s30 = sshll.u32 %s1933_s7, 4  ;;  %s1792_s30 = int_to_ptr.vmem [resolvable:$false] %s1791_s30 }
  0x9b   : > { %s1793_s25 = scalar_lea.vmem %s1792_s30, 128  ;;  %p1794_p4 = scmp.lt.s32.totalorder %s330_s27, %s1792_s30 }
  0x9c   : > { %p1789_p9 = pnand %p1787_p5, %p2485_p11  ;;  %p1795_p7 = scmp.lt.s32.totalorder %s1793_s25, %s1786_s23 }
  0x9e   : > { %p1790_p2 = pneg %p1789_p9  ;;  %p1796_p3 = por %p1795_p7, %p1794_p4 }
  0xa0   : > { %p1797_p1 = pnand %p1796_p3, %p1790_p2 }
  0xa2   : > { %1800 = shalt.err (!%p1797_p1)
}
  0xa3   : > { %p2486_p10 = scmp.ne.s32.totalorder %s2477_s20, 0  ;;  %s2225_s10 = scalar_lea.hbm %s2424_s2, %s2101_s22 }
  0xa4   : > { %s358_s21 = scalar_lea.vmem [#allocation10], %s2098_s17  ;;  %s1801_s9 = scalar_lea.hbm %s2225_s10, 64 }
  0xa5   : > { %1551 = dma.hbm_to_vmem [thread:$0]  (!%p2486_p10), %s2199_s12, 64, %s330_s27, %s318_s19  }
  0xa6   : > { %s365_s1 = sshll.u32 %s358_s21, 4  ;;  %p1802_p13 = scmp.ne.s32.totalorder %s2225_s10, %s1801_s9  ;;  %s366_s1 = int_to_ptr.vmem [resolvable:$true] %s365_s1 }
  0xa7   : > { %s1806_s12 = scalar_lea.hbm %s2424_s2, 128  ;;  %p1807_p12 = scmp.lt.u32.totalorder %s2225_s10, %s2424_s2 }
  0xa8   : > { %p1804_p6 = pnand %p1802_p13, %p2485_p11  ;;  %p1808_p0 = scmp.lt.u32.totalorder %s1806_s12, %s1801_s9 }
  0xa9   : > { %p1810_p9 = scmp.lt.u32.totalorder %s1801_s9, %s2225_s10 }
  0xaa   : > { %p1805_p8 = pneg %p1804_p6  ;;  %p1809_p5 = por %p1808_p0, %p1807_p12 }
  0xac   : > { %p1811_p2 = por %p1810_p9, %p1809_p5 }
  0xae   : > { %p1812_p4 = pnand %p1811_p2, %p1805_p8 }
  0xb0   : > { %1815 = shalt.err (!%p1812_p4)
}
  0xb1   : > { %s1816_s17 = scalar_lea.vmem %s366_s1, 64  ;;  %s1934_s22 = smov [#allocation10]  }
  0xb2   : > { %p1817_p7 = scmp.ne.s32.totalorder %s366_s1, %s1816_s17  ;;  %s1821_s8 = sshll.u32 %s1934_s22, 4  ;;  %s1822_s8 = int_to_ptr.vmem [resolvable:$false] %s1821_s8 }
  0xb3   : > { %s1823_s23 = scalar_lea.vmem %s1822_s8, 128  ;;  %p1824_p13 = scmp.lt.s32.totalorder %s366_s1, %s1822_s8 }
  0xb4   : > { %p1819_p3 = pnand %p1817_p7, %p2485_p11  ;;  %p1825_p6 = scmp.lt.s32.totalorder %s1823_s23, %s1816_s17 }
  0xb6   : > { %p1820_p1 = pneg %p1819_p3  ;;  %p1826_p10 = por %p1825_p6, %p1824_p13 }
  0xb8   : > { %p1827_p0 = pnand %p1826_p10, %p1820_p1 }
  0xba   : > { %1830 = shalt.err (!%p1827_p0)
}
  0xbb   : > { %p2487_p12 = scmp.ne.s32.totalorder %s2477_s20, 0  ;;  %p2488_p8 = scmp.ne.s32.totalorder %s2468_s15, 0 }
  0xbc   : > { %s2249_s3 = sand.u32 (!%p2488_p8), 1, %s1909_s28   ;;  %p2489_p11 = scmp.ne.s32.totalorder (!%p2488_p8), %s2465_s13, 0 }
  0xbd   : > { %1557 = dma.hbm_to_vmem [thread:$0]  (!%p2487_p12), %s2225_s10, 64, %s366_s1, %s2122_s14  }
  0xbe   : > { %374 = sbr.rel (%p2488_p8) target bundleno = 1520 (0x5f0), region = 52  ;;  %s2252_s7 = sshll.u32 (!%p2488_p8), %s2249_s3, 2 }
  0xbf   : > { %s377_s30 = scalar_lea.sflag (!%p2488_p8), [#allocation6], %s2249_s3  ;;  %s380_s25 = scalar_lea.vmem (!%p2488_p8), [#allocation5], %s2252_s7 }
  0xc5   : > { %1884 = dma.done.wait (%p2489_p11), %s377_s30, 64  }
  0xc6   : > { %1886 = vsyncadd (%p2489_p11), %s377_s30, 4294967232  ;;  %s385_s14 = sand.u32 1, %s2020_s11   ;;  %s389_s20 = scalar_lea.vmem [#allocation8], %s2252_s7 }
  0xc7   : > { %s386_s15 = scalar_lea.sflag [#allocation9], %s385_s14 }
  0xc8   : > { %1888 = dma.done.wait (%p2489_p11), %s386_s15, 128  }
  0xc9   : > { %1890 = vsyncadd (%p2489_p11), %s386_s15, 4294967168  ;;  %s398_s26 = scalar_lea.vmem [#allocation10], %s2252_s7  ;;  %p2490_p10 = scmp.eq.s32.totalorder %s2020_s11, 0 }
  0xcb   : > { %1892 = dma.done.wait (%p2490_p10), [#allocation12], 512   ;;  %p2491_p5 = pmov %p2490_p10 }
  0xcd   : > { %1894 = vsyncadd (%p2491_p5), [#allocation12], 4294966784  ;;  %p2492_p9 = pmov %p2491_p5 }
  0xce   : > { %p2493_p2 = pmov %p2491_p5 }
  0xcf   : > { %1896 = dma.done.wait (%p2492_p9), [#allocation15], 256  }
  0xd0   : > { %1898 = vsyncadd (%p2493_p2), [#allocation15], 4294967040  ;;  %v1935_v0 = vmov 0.0   ;;  %vm1936_vm0 = vmmov 0   ;;  %v1631_v1 = vld [vmem:[#allocation13] sm:$0xff]   ;;  %v1632_v2 = vld [vmem:[#allocation13 + $0x8] sm:$0xff]  }
  0xd1   : > { %1438 = vmatprep.subr.bf16.mxu0 %v1935_v0  ;;  %1442 = vmatprep.mubr.msk.bf16.mxu0 %vm1936_vm0, %v1935_v0  ;;  %v458_v3 = vld [vmem:[%s389_s20] sm:$0xf]  ;;  %v1633_v4 = vld [vmem:[#allocation11] sm:$0xff]   ;;  %vm475_vm1 = vcmask 261120   ;;  %v1634_v6 = vld [vmem:[#allocation11 + $0x8] sm:$0xff]   ;;  %vm520_vm2 = vcmask 257024  }
  0xd2   : > { %1446 = vmatprep.subr.bf16.mxu1 %v1935_v0  ;;  %1450 = vmatprep.mubr.msk.bf16.mxu1 %vm1936_vm0, %v1935_v0  ;;  %v1635_v5 = vld [vmem:[%s2427_s5] sm:$0xff]   ;;  %v1636_v8 = vld [vmem:[%s2427_s5 + $0x8] sm:$0xff]   ;;  %vm648_vm3 = vcmask 64512   ;;  %s1937_s21 = smov 112   ;;  %s1938_s1 = smov 120   ;;  %vm708_vm4 = vcmask 1043456  }
  0xd3   : > { %1439 = vmatpush3.bf16.msra.mxu0 %v1631_v1  ;;  %1447 = vmatpush3.bf16.msra.mxu1 %v1635_v5  ;;  %v584_v7 = vld [vmem:[%s380_s25] sm:$0xf]  ;;  %v522_v9 = vld [vmem:[%s398_s26] sm:$0xf]  ;;  %s1939_s9 = smov 104   ;;  %vm755_vm5 = vcmask 60416  }
  0xd4   : > { %1440 = vmatprep.subr.bf16.mxu0 %v1935_v0  ;;  %1448 = vmatprep.subr.bf16.mxu1 %v1935_v0  ;;  %s1940_s24 = smov 8   ;;  %s1941_s16 = smov 16   ;;  %vm881_vm6 = vcmask 126016   ;;  %vm1000_vm7 = vcmask 191616   ;;  %vm1119_vm8 = vcmask 257216  }
  0xd5   : > { %s2494_s12 = sld [smem:[#allocation23_spill]]  ;;  %s1942_s27 = smov 24  }
  0xd6   : > { %s1376_s19 = sshll.u32 %s2249_s3, 3  ;;  %s2495_s8 = sld [smem:[#allocation32_spill]] }
  0xd7   : > { %1441 = vmatpush3.bf16.msra.mxu0 %v1632_v2  ;;  %1449 = vmatpush3.bf16.msra.mxu1 %v1636_v8  ;;  %s2496_s23 = sld [smem:[#allocation28_spill]]  ;;  %s452_s30 = scalar_lea.vmem [#allocation16], %s1376_s19 }
  0xd8   : > { %1454 = vmatprep.subr.bf16.mxu0 %v1935_v0  ;;  %1462 = vmatprep.subr.bf16.mxu1 %v1935_v0  ;;  %s1204_s25 = sshll.u32 %s452_s30, 4  ;;  %s2497_s20 = sld [smem:[#allocation33_spill]]  ;;  %s2374_s25 = int_to_ptr.vmem [resolvable:$true] %s1204_s25 }
  0xd9   : > { %s1190_s11 = scalar_lea.sflag [#allocation7], %s2249_s3  ;;  %s1831_s13 = scalar_lea.vmem %s2374_s25, 128 }
  0xda   : > { %1443 = vmatmul.mubr.msk.bf16.vlgmr.msra.gmra.mrb[0].mxu0 %vm475_vm1, %v458_v3  ;;  %1451 = vmatmul.mubr.msk.bf16.vlgmr.msra.gmra.mrb[0].mxu1 %vm475_vm1, %v522_v9  ;;  %p1832_p4 = scmp.ne.s32.totalorder %s2374_s25, %s1831_s13  ;;  %s1943_s18 = smov [#allocation16]  }
  0xdb   : > { %1455 = vmatpush3.bf16.msra.mxu0 %v1633_v4  ;;  %1458 = vmatprep.mubr.msk.bf16.mxu0 %vm1936_vm0, %v1935_v0  ;;  %s1404_s7 = sshll.u32 %s2494_s12, 7  ;;  %s1835_s10 = sshll.u32 %s1943_s18, 4  ;;  %s1836_s10 = int_to_ptr.vmem [resolvable:$false] %s1835_s10 }
  0xdc   : > { %1456 = vmatprep.subr.bf16.mxu0 %v1935_v0  ;;  %1464 = vmatprep.mubr.msk.bf16.mxu1 %vm1936_vm0, %v1935_v0  ;;  %p1838_p13 = scmp.lt.s32.totalorder %s2374_s25, %s1836_s10 }
  0xdd   : > { %p2498_p7 = scmp.ne.s32.totalorder %s2496_s23, 0 }
  0xde   : > { %s2372_s26 = scalar_lea.hbm %s2497_s20, %s1404_s7 }
  0xdf   : > { %1457 = vmatpush3.bf16.msra.mxu0 %v1634_v6  ;;  %p1833_p3 = pnand %p1832_p4, %p2498_p7 }
  0xe0   : > { %1468 = vmatprep.subr.bf16.mxu0 %v1935_v0 }
  0xe1   : > { %p1834_p1 = pneg %p1833_p3 }
  0xe2   : > { %1459 = vmatmul.mubr.msk.bf16.vlgmr.msra.gmra.mrb[4].mxu0 %vm475_vm1, %v584_v7 }
  0xe3   : > { %1470 = vmatprep.mubr.msk.bf16.mxu0 %vm1936_vm0, %v1935_v0 }
 0x1ad   : > { %v513_v10 = vpop.f32.mrb[0].mxu0  ;;  %v576_v23 = vpop.f32.mrb[0].mxu1 }
 0x1ae   : > { %v519_v11 = vpack.c.bf16 %v513_v10, %v513_v10  ;;  %v1444_v12 = vpop.f32.mrb[1].mxu0  ;;  %v582_v24 = vpack.c.bf16 %v576_v23, %v576_v23  ;;  %v1452_v25 = vpop.f32.mrb[1].mxu1 }
 0x1af   : > { %v516_v13 = vpop.f32.mrb[2].mxu0  ;;  %v579_v26 = vpop.f32.mrb[2].mxu1 }
 0x1b0   : > { %521 = vst.msk [vmem:[#allocation2] sm:$0xf] %vm520_vm2, %v519_v11  ;;  %v1445_v14 = vpop.f32.mrb[3].mxu0  ;;  %583 = vst.msk [vmem:[#allocation3] sm:$0xf] %vm520_vm2, %v582_v24  ;;  %v1453_v27 = vpop.f32.mrb[3].mxu1 }
 0x1b5   : > { %v639_v15 = vpop.f32.mrb[4].mxu0 }
 0x1b6   : > { %v1460_v16 = vpop.f32.mrb[5].mxu0  ;;  %v645_v22 = vpack.c.bf16 %v639_v15, %v639_v15 }
 0x1b7   : > { %v646_v17 = vld [vmem:[#allocation2] sm:$0xf]  ;;  %v642_v18 = vpop.f32.mrb[6].mxu0  ;;  %v647_v28 = vld [vmem:[#allocation3] sm:$0xf] }
 0x1b8   : > { %v653_v19 = vsel %vm648_vm3, %v646_v17, 0  ;;  %v1388_v20 = vcombine.low %v646_v17, %v646_v17  ;;  %v1461_v21 = vpop.f32.mrb[7].mxu0  ;;  %v710_v29 = vsel %vm708_vm4, %v647_v28, 0  ;;  %v1390_v57 = vcombine.low %v647_v28, %v647_v28 }
 0x1b9   : > { %1463 = vmatpush3.bf16.xpose.msra.mxu1 %v653_v19  ;;  %1469 = vmatpush3.bf16.msra.mxu0 %v710_v29 }
 0x1ba   : > { %885 = vrot.lane.b32.xlu1 %v1388_v20, %s1937_s21  ;;  %763 = vrot.lane.b32.xlu0 %v1388_v20, %s1938_s1 }
 0x1bb   : > { %1474 = vmatprep.subr.bf16.mxu1 %v1935_v0  ;;  %1480 = vmatprep.subr.bf16.mxu0 %v1935_v0 }
 0x1be   : > { %883 = vrot.lane.b32.xlu1 %v645_v22, %s1937_s21  ;;  %758 = vrot.lane.b32.xlu0 %v645_v22, %s1938_s1 }
 0x1c0   : > { %1465 = vmatmul.mubr.msk.bf16.vlgmr.msra.gmra.mrb[4].mxu1 %vm648_vm3, %v645_v22 }
 0x1c1   : > { %1476 = vmatprep.mubr.msk.bf16.mxu1 %vm1936_vm0, %v1935_v0 }
 0x1c2   : > { %1002 = vrot.lane.b32.xlu1 %v645_v22, %s1939_s9  ;;  %1004 = vrot.lane.b32.xlu0 %v1388_v20, %s1939_s9 }
 0x22c   : > { %v764_v30 = vpop.permute.xlu0 %763  ;;  %v886_v32 = vpop.permute.xlu1 %885 }
 0x22d   : > { %v769_v31 = vsel %vm648_vm3, %v764_v30, 0  ;;  %v891_v34 = vsel %vm648_vm3, %v886_v32, 0 }
 0x22e   : > { %1475 = vmatpush3.bf16.xpose.msra.mxu1 %v769_v31 }
 0x22f   : > { %1486 = vmatprep.subr.bf16.mxu1 %v1935_v0 }
 0x230   : > { %v759_v33 = vpop.permute.xlu0 %758  ;;  %v884_v36 = vpop.permute.xlu1 %883 }
 0x234   : > { %v1005_v35 = vpop.permute.xlu0 %1004  ;;  %v1003_v38 = vpop.permute.xlu1 %1002 }
 0x235   : > { %1477 = vmatmul.mubr.msk.bf16.vlgmr.msra.gmra.mrb[8].mxu1 %vm648_vm3, %v759_v33  ;;  %v1010_v37 = vsel %vm648_vm3, %v1005_v35, 0 }
 0x236   : > { %1487 = vmatpush3.bf16.xpose.msra.mxu1 %v891_v34  ;;  %1488 = vmatprep.mubr.msk.bf16.mxu1 %vm1936_vm0, %v1935_v0 }
 0x237   : > { %1498 = vmatprep.subr.bf16.mxu1 %v1935_v0 }
 0x23d   : > { %1489 = vmatmul.mubr.msk.bf16.vlgmr.msra.gmra.mrb[12].mxu1 %vm648_vm3, %v884_v36 }
 0x23e   : > { %1499 = vmatpush3.bf16.xpose.msra.mxu1 %v1010_v37  ;;  %1500 = vmatprep.mubr.msk.bf16.mxu1 %vm1936_vm0, %v1935_v0 }
 0x23f   : > { %1510 = vmatprep.subr.bf16.mxu1 %v1935_v0 }
 0x245   : > { %1501 = vmatmul.mubr.msk.bf16.vlgmr.msra.gmra.mrb[16].mxu1 %vm648_vm3, %v1003_v38 }
 0x246   : > { %1514 = vmatprep.mubr.msk.bf16.mxu1 %vm1936_vm0, %v1935_v0 }
 0x293   : > { %v689_v39 = vpop.f32.mrb[4].mxu1 }
 0x294   : > { %v1466_v40 = vpop.f32.mrb[5].mxu1  ;;  %v695_v41 = vsel %vm648_vm3, %v689_v39, -inf }
 0x295   : > { %696 = vmax.xlane.f32.xlu0 %v695_v41  ;;  %v692_v42 = vpop.f32.mrb[6].mxu1 }
 0x296   : > { %v1467_v43 = vpop.f32.mrb[7].mxu1 }
 0x308   : > { %v805_v44 = vpop.f32.mrb[8].mxu1 }
 0x309   : > { %v1478_v45 = vpop.f32.mrb[9].mxu1  ;;  %v811_v46 = vsel %vm648_vm3, %v805_v44, -inf }
 0x30a   : > { %812 = vmax.xlane.f32.xlu1 %v811_v46  ;;  %v808_v47 = vpop.f32.mrb[10].mxu1 }
 0x30b   : > { %v1479_v48 = vpop.f32.mrb[11].mxu1  ;;  %v1639_v47 = vld [vmem:[#allocation14] sm:$0xff]  }
 0x30c   : > { %1511 = vmatpush3.bf16.msra.mxu1 %v1639_v47 }
 0x30d   : > { %1512 = vmatprep.subr.bf16.mxu1 %v1935_v0 }
 0x310   : > { %v927_v49 = vpop.f32.mrb[12].mxu1 }
 0x311   : > { %v1490_v50 = vpop.f32.mrb[13].mxu1  ;;  %v933_v51 = vsel %vm648_vm3, %v927_v49, -inf }
 0x312   : > { %934 = vmax.xlane.f32.xlu0 %v933_v51  ;;  %v930_v52 = vpop.f32.mrb[14].mxu1  ;;  %v1640_v51 = vld [vmem:[#allocation14 + $0x8] sm:$0xff]  }
 0x313   : > { %v1491_v53 = vpop.f32.mrb[15].mxu1  ;;  %1513 = vmatpush3.bf16.msra.mxu1 %v1640_v51 }
 0x318   : > { %v1046_v54 = vpop.f32.mrb[16].mxu1 }
 0x319   : > { %v1502_v55 = vpop.f32.mrb[17].mxu1  ;;  %v1052_v56 = vsel %vm648_vm3, %v1046_v54, -inf }
 0x31a   : > { %1053 = vmax.xlane.f32.xlu0 %v1052_v56  ;;  %v1049_v58 = vpop.f32.mrb[18].mxu1 }
 0x31b   : > { %824 = vrot.lane.b32.xlu1 %v1390_v57, %s1938_s1  ;;  %v1503_v59 = vpop.f32.mrb[19].mxu1 }
 0x31f   : > { %1062 = vrot.lane.b32.xlu1 %v1390_v57, %s1939_s9 }
 0x322   : > { %v697_v60 = vpop.xlane.xlu0 %696 }
 0x323   : > { %v698_v61 = vsub.f32 %v689_v39, %v697_v60 }
 0x325   : > { %v699_v62 = vmul.f32 1.442695, %v698_v61 }
 0x327   : > { %1641 = vpow2.f32 %v699_v62 }
 0x330   : > { %943 = vrot.lane.b32.xlu0 %v1390_v57, %s1937_s21  ;;  %s1837_s21 = scalar_lea.vmem %s1836_s10, 256 }
 0x331   : > { %v1642_v63 = vpop.eup %1641  ;;  %p1839_p6 = scmp.lt.s32.totalorder %s1837_s21, %s1831_s13 }
 0x332   : > { %v704_v1 = vpack.c.bf16 %v1642_v63, %v1642_v63  ;;  %v701_v17 = vsel %vm648_vm3, %v1642_v63, 0.0 }
 0x333   : > { %p1840_p0 = por %p1839_p6, %p1838_p13 }
 0x334   : > { %1471 = vmatmul.mubr.msk.bf16.vlgmr.msra.gmra.mrb[8].mxu0 %vm648_vm3, %v704_v1  ;;  %v1399_v1 = vld [vmem:[%s2495_s8] ss:$0 sm:$0xff] }
 0x335   : > { %1482 = vmatprep.mubr.msk.bf16.mxu0 %vm1936_vm0, %v1935_v0  ;;  %p1841_p12 = pnand %p1840_p0, %p1834_p1 }
 0x397   : > { %v813_v2 = vpop.xlane.xlu1 %812 }
 0x398   : > { %v814_v3 = vsub.f32 %v805_v44, %v813_v2 }
 0x39a   : > { %v815_v4 = vmul.f32 1.442695, %v814_v3 }
 0x39b   : > { %v825_v5 = vpop.permute.xlu1 %824 }
 0x39c   : > { %1643 = vpow2.f32 %v815_v4  ;;  %v830_v6 = vsel %vm708_vm4, %v825_v5, 0 }
 0x39d   : > { %1481 = vmatpush3.bf16.msra.mxu0 %v830_v6 }
 0x39e   : > { %1492 = vmatprep.subr.bf16.mxu0 %v1935_v0 }
 0x39f   : > { %v935_v7 = vpop.xlane.xlu0 %934  ;;  %v1063_v20 = vpop.permute.xlu1 %1062 }
 0x3a0   : > { %v936_v8 = vsub.f32 %v927_v49, %v935_v7  ;;  %v1068_v23 = vsel %vm708_vm4, %v1063_v20, 0 }
 0x3a2   : > { %v937_v9 = vmul.f32 1.442695, %v936_v8 }
 0x3a4   : > { %1645 = vpow2.f32 %v937_v9 }
 0x3a6   : > { %v1644_v10 = vpop.eup %1643 }
 0x3a7   : > { %v1054_v11 = vpop.xlane.xlu0 %1053  ;;  %v817_v12 = vsel %vm648_vm3, %v1644_v10, 0.0  ;;  %v820_v13 = vpack.c.bf16 %v1644_v10, %v1644_v10 }
 0x3a8   : > { %v1055_v14 = vsub.f32 %v1046_v54, %v1054_v11  ;;  %818 = vadd.xlane.f32.xlu1 %v817_v12 }
 0x3a9   : > { %1483 = vmatmul.mubr.msk.bf16.vlgmr.msra.gmra.mrb[12].mxu0 %vm648_vm3, %v820_v13 }
 0x3aa   : > { %v1056_v15 = vmul.f32 1.442695, %v1055_v14  ;;  %1494 = vmatprep.mubr.msk.bf16.mxu0 %vm1936_vm0, %v1935_v0 }
 0x3ab   : > { %v944_v16 = vpop.permute.xlu0 %943 }
 0x3ac   : > { %1647 = vpow2.f32 %v1056_v15  ;;  %v949_v18 = vsel %vm708_vm4, %v944_v16, 0  ;;  %702 = vadd.xlane.f32.xlu1 %v701_v17 }
 0x3ad   : > { %1493 = vmatpush3.bf16.msra.mxu0 %v949_v18 }
 0x3ae   : > { %v1646_v19 = vpop.eup %1645  ;;  %1504 = vmatprep.subr.bf16.mxu0 %v1935_v0 }
 0x3af   : > { %v939_v21 = vsel %vm648_vm3, %v1646_v19, 0.0  ;;  %v942_v22 = vpack.c.bf16 %v1646_v19, %v1646_v19 }
 0x3b0   : > { %940 = vadd.xlane.f32.xlu0 %v939_v21 }
 0x3b1   : > { %1495 = vmatmul.mubr.msk.bf16.vlgmr.msra.gmra.mrb[16].mxu0 %vm648_vm3, %v942_v22 }
 0x3b2   : > { %1505 = vmatpush3.bf16.msra.mxu0 %v1068_v23  ;;  %1506 = vmatprep.mubr.msk.bf16.mxu0 %vm1936_vm0, %v1935_v0 }
 0x3b6   : > { %v1648_v24 = vpop.eup %1647 }
 0x3b7   : > { %v1058_v25 = vsel %vm648_vm3, %v1648_v24, 0.0  ;;  %v1061_v26 = vpack.c.bf16 %v1648_v24, %v1648_v24 }
 0x3b8   : > { %1059 = vadd.xlane.f32.xlu0 %v1058_v25 }
 0x3b9   : > { %1507 = vmatmul.mubr.msk.bf16.vlgmr.msra.gmra.mrb[20].mxu0 %vm648_vm3, %v1061_v26 }
 0x407   : > { %v746_v27 = vpop.f32.mrb[8].mxu0 }
 0x408   : > { %v1472_v28 = vpop.f32.mrb[9].mxu0 }
 0x409   : > { %v749_v29 = vpop.f32.mrb[10].mxu0 }
 0x40a   : > { %v1473_v30 = vpop.f32.mrb[11].mxu0 }
 0x435   : > { %v819_v31 = vpop.xlane.xlu1 %818 }
 0x439   : > { %v703_v32 = vpop.xlane.xlu1 %702 }
 0x43a   : > { %1649 = vrcp.f32 %v703_v32 }
 0x43b   : > { %1651 = vrcp.f32 %v819_v31 }
 0x43d   : > { %v941_v36 = vpop.xlane.xlu0 %940 }
 0x43e   : > { %1653 = vrcp.f32 %v941_v36 }
 0x444   : > { %v1650_v33 = vpop.eup %1649 }
 0x445   : > { %v753_v34 = vmul.f32 %v1650_v33, %v746_v27  ;;  %v1652_v37 = vpop.eup %1651  ;;  %v1060_v42 = vpop.xlane.xlu0 %1059 }
 0x446   : > { %1655 = vrcp.f32 %v1060_v42 }
 0x447   : > { %v754_v35 = vpack.c.bf16 %v753_v34, %v753_v34 }
 0x448   : > { %v1654_v45 = vpop.eup %1653 }
 0x449   : > { %756 = vst.msk [vmem:[#allocation4] sm:$0xf] %vm755_vm5, %v754_v35 }
 0x450   : > { %v1656_v54 = vpop.eup %1655 }
 0x47c   : > { %v866_v38 = vpop.f32.mrb[12].mxu0 }
 0x47d   : > { %v873_v39 = vmul.f32 %v1652_v37, %v866_v38  ;;  %v1484_v40 = vpop.f32.mrb[13].mxu0 }
 0x47e   : > { %v869_v41 = vpop.f32.mrb[14].mxu0 }
 0x47f   : > { %v1407_v43 = vpack.c.bf16 %v873_v39, %v873_v39  ;;  %v1485_v44 = vpop.f32.mrb[15].mxu0 }
 0x481   : > { %878 = vrot.lane.b32.xlu0 %v1407_v43, %s1940_s24 }
 0x484   : > { %v985_v46 = vpop.f32.mrb[16].mxu0 }
 0x485   : > { %v992_v48 = vmul.f32 %v1654_v45, %v985_v46  ;;  %v1496_v49 = vpop.f32.mrb[17].mxu0 }
 0x486   : > { %v988_v50 = vpop.f32.mrb[18].mxu0 }
 0x487   : > { %v1408_v52 = vpack.c.bf16 %v992_v48, %v992_v48  ;;  %v1497_v53 = vpop.f32.mrb[19].mxu0 }
 0x489   : > { %997 = vrot.lane.b32.xlu1 %v1408_v52, %s1941_s16 }
 0x48c   : > { %v1104_v55 = vpop.f32.mrb[20].mxu0 }
 0x48d   : > { %v1111_v56 = vmul.f32 %v1656_v54, %v1104_v55  ;;  %v1508_v57 = vpop.f32.mrb[21].mxu0 }
 0x48e   : > { %v1107_v58 = vpop.f32.mrb[22].mxu0 }
 0x48f   : > { %v1409_v59 = vpack.c.bf16 %v1111_v56, %v1111_v56  ;;  %v1509_v60 = vpop.f32.mrb[23].mxu0 }
 0x491   : > { %1116 = vrot.lane.b32.xlu1 %v1409_v59, %s1942_s27 }
 0x4f3   : > { %v879_v61 = vpop.permute.xlu0 %878 }
 0x4f4   : > { %882 = vst.msk [vmem:[#allocation4] sm:$0xf] %vm881_vm6, %v879_v61 }
 0x4fb   : > { %v998_v62 = vpop.permute.xlu1 %997 }
 0x4fc   : > { %1001 = vst.msk [vmem:[#allocation4] sm:$0xf] %vm1000_vm7, %v998_v62 }
 0x503   : > { %v1117_v0 = vpop.permute.xlu1 %1116 }
 0x504   : > { %1120 = vst.msk [vmem:[#allocation4] sm:$0xf] %vm1119_vm8, %v1117_v0 }
 0x50b   : > { %v1121_v63 = vld [vmem:[#allocation4] sm:$0xf] }
 0x50c   : > { %1515 = vmatmul.mubr.msk.bf16.vlgmr.msra.gmra.mrb[20].mxu1 %vm475_vm1, %v1121_v63 }
 0x5df   : > { %v1182_v2 = vpop.f32.mrb[20].mxu1 }
 0x5e0   : > { %v1183_v3 = vadd.f32 %v1399_v1, %v1182_v2  ;;  %v1516_v4 = vpop.f32.mrb[21].mxu1 }
 0x5e1   : > { %v1185_v5 = vpop.f32.mrb[22].mxu1 }
 0x5e2   : > { %v1517_v6 = vpop.f32.mrb[23].mxu1  ;;  %1188 = vst.msk [vmem:[%s452_s30] sm:$0xff] %vm475_vm1, %v1183_v3 }
 0x5e3   : > { %1844 = shalt.err (!%p1841_p12)
}
 0x5e4   : > { %s1845_s3 = scalar_lea.hbm %s2372_s26, 128  ;;  %s1849_s24 = scalar_lea.hbm %s2497_s20, 256 }
 0x5e5   : > { %p1846_p8 = scmp.ne.s32.totalorder %s2372_s26, %s1845_s3  ;;  %p1850_p5 = scmp.lt.u32.totalorder %s2372_s26, %s2497_s20 }
 0x5e6   : > { %p1851_p9 = scmp.lt.u32.totalorder %s1849_s24, %s1845_s3  ;;  %p1853_p4 = scmp.lt.u32.totalorder %s1845_s3, %s2372_s26 }
 0x5e7   : > { %p1847_p11 = pnand %p1846_p8, %p2498_p7 }
 0x5e8   : > { %p1852_p2 = por %p1851_p9, %p1850_p5 }
 0x5e9   : > { %p1848_p10 = pneg %p1847_p11 }
 0x5ea   : > { %p1854_p3 = por %p1853_p4, %p1852_p2 }
 0x5ec   : > { %p1855_p1 = pnand %p1854_p3, %p1848_p10 }
 0x5ee   : > { %1858 = shalt.err (!%p1855_p1)
}
 0x5ef   : > { %1536 = dma.vmem_to_hbm [thread:$0]  (%p2498_p7), %s2374_s25, 128, %s2372_s26, %s1190_s11  }
 0x5f0 PF: > { %s2499_s27 = sld [smem:[#allocation22_spill]]  ;;  %s2500_s19 = sld [smem:[#allocation26_spill]] }
 0x5f1   : > { %s2501_s17 = sld [smem:[#allocation25_spill]] }
 0x5f6   : > { %s1216_s22 = sand.u32 1, %s2499_s27   ;;  %p2502_p13 = scmp.ne.s32.totalorder %s2500_s19, 0 }
 0x5f7   : > { %p2503_p6 = scmp.ge.s32.totalorder %s2501_s17, 2  ;;  %s1217_s8 = scalar_lea.sflag [#allocation7], %s1216_s22 }
 0x5f9   : > { %p1559_p0 = pnand %p2503_p6, %p2502_p13 }
 0x5fb   : > { %1900 = dma.done.wait (!%p1559_p0), %s1217_s8, 128  }
 0x5fc   : > { %1902 = vsyncadd (!%p1559_p0), %s1217_s8, 4294967168  ;;  %s29_s10 = sadd.s32 1, %s2501_s17   ;;  %s2504_s23 = sld [smem:[#allocation29_spill]] }
 0x5fd   : > { %p26_p12 = scmp.ge.s32.totalorder %s29_s10, 4   ;;  %s2505_s30 = sld [smem:[#allocation24_spill]] }
 0x5fe   : > { %s2506_s9 = sld [smem:[#allocation27_spill]]  ;;  %s2507_s27 = smov %s1909_s28 }
 0x5ff   : > { %s2508_s28 = smov %s1913_s29  ;;  %28 = sbr.rel (!%p26_p12) target bundleno = 15 (0xf), region = 137 }
 0x602   : > { %s2509_s29 = smov %s2504_s23 }
 0x606   :  { %1222 = vsyncpa [#allocation6], 1 }
 0x607   :  { %1224 = vsyncpa [#allocation6 + $0x1], 1 }
 0x608   :  { %1225 = vsyncpa [#allocation9], 1 }
 0x609   :  { %1227 = vsyncpa [#allocation9 + $0x1], 1 }
 0x60a   :  { %1228 = vsyncpa [#allocation12], 1 }
 0x60b   :  { %1229 = vsyncpa [#allocation15], 1 }
 0x60c   :  { %1230 = vsyncpa [#allocation7], 1 }
 0x60d   :  { %1232 = vsyncpa [#allocation7 + $0x1], 1 }

</bundles_post_ra>
